<compile_context>
chip_gen: v6e
topology: v6e:2x2x1
jax: 0.10.0
libtpu: 0.0.40
codegen_flags: <defaults>
</compile_context>

<pallas_src>
import functools
import math

import jax
import jax.numpy as jnp
from jax.experimental import pallas as pl
from jax.experimental.pallas import tpu as pltpu


def _round_up(a, b):
    return (a + b - 1) // b * b


def _linear3d(x, w, b):
    """y[k,t,u] = b[u] + sum_c x[k,t,c] * w[c,u] via cin broadcast FMAs (VPU).

    cin is tiny, so an unrolled broadcast-multiply-add beats pushing a 4-deep
    contraction through the 256-wide MXU and avoids the (bk,T,cin)->(bk*T,cin)
    relayout a matmul would need.
    """
    bk, t, cin = x.shape
    units = w.shape[-1]
    y = jnp.broadcast_to(b.reshape(1, 1, units), (bk, t, units))
    for c in range(cin):
        y = y + x[:, :, c:c + 1] * w[c, :].reshape(1, 1, units)
    return y


# ----------------------------------------------------------------------------
# Stage 1: per-block partial batch statistics of y = x W + b.
# ----------------------------------------------------------------------------
def _stats_kernel(x_ref, w_ref, b_ref, stats_ref, *, total_k):
    i = pl.program_id(0)
    bk = x_ref.shape[0]
    y = _linear3d(x_ref[...], w_ref[...], b_ref[...])          # (bk, T, units)

    # Mask padded voxels (K rounded up to a multiple of bk) out of the stats.
    row = i * bk + jax.lax.broadcasted_iota(jnp.int32, (bk, 1, 1), 0)
    yv = jnp.where(row < total_k, y, 0.0)

    s = jnp.sum(jnp.sum(yv, axis=0), axis=0, keepdims=True)            # (1, u)
    ss = jnp.sum(jnp.sum(yv * yv, axis=0), axis=0, keepdims=True)      # (1, u)
    stats_ref[...] = jnp.concatenate([s, ss], axis=0)[None]            # (1,2,u)


# ----------------------------------------------------------------------------
# Stage 2: fused (BN-folded) linear + ReLU + max-over-T + concat + mask.
# ----------------------------------------------------------------------------
def _fuse_kernel(x_ref, w_ref, b_ref, mask_ref, out_ref):
    units = w_ref.shape[-1]
    y = _linear3d(x_ref[...], w_ref[...], b_ref[...])   # BN affine pre-folded
    pwf = jnp.maximum(y, 0.0)                           # (bk, T, units)
    laf = jnp.max(pwf, axis=1, keepdims=True)           # (bk, 1, units)
    m = mask_ref[...][:, :, None]                       # (bk, T, 1)
    # Two direct half-stores: no concatenate / broadcast_to temporaries.
    # TODO(synk): with units=16 the lane width is 32 (<128) so these are masked
    # stores; for the production VFE(32,128) layer (2*units=128) they are
    # already lane-dense.
    out_ref[:, :, :units] = pwf * m
    out_ref[:, :, units:] = laf * m


@functools.partial(jax.jit, static_argnames=("eps", "bk"))
def vfe_forward(x, mask, w, b, gamma, beta, *, eps=1e-5, bk=2048):
    K, T, cin = x.shape
    units = w.shape[1]

    # Voxel tile: large enough to amortize per-step overhead and reach HBM
    # roofline, clamped for small K, multiple of 8 (sublane tiling of mask).
    bk_eff = _round_up(max(8, min(bk, K)), 8)
    kpad = _round_up(K, bk_eff)
    nblk = kpad // bk_eff
    if kpad != K:
        x = jnp.pad(x, ((0, kpad - K), (0, 0), (0, 0)))
        mask = jnp.pad(mask, ((0, kpad - K), (0, 0)))

    # Explicit VMEM budget: above the 16/32 MiB scoped defaults, with headroom
    # under v7x's 64 MiB physical VMEM (blocks double-buffer comfortably).
    blk_bytes = 4 * (bk_eff * T * cin + cin * units + units
                     + bk_eff * T + bk_eff * T * 2 * units)
    vmem_limit = int(min(max(6 * blk_bytes, 32 * 1024 * 1024),
                         48 * 1024 * 1024))

    w = w.astype(jnp.float32)
    b2 = b.reshape(1, units).astype(jnp.float32)

    # --- Stage 1: per-block partial batch statistics --------------------------
    stats = pl.pallas_call(
        functools.partial(_stats_kernel, total_k=K),
        out_shape=jax.ShapeDtypeStruct((nblk, 2, units), jnp.float32),
        grid_spec=pltpu.PrefetchScalarGridSpec(
            num_scalar_prefetch=0,
            grid=(nblk,),
            in_specs=[
                pl.BlockSpec((bk_eff, T, cin), lambda i: (i, 0, 0)),
                pl.BlockSpec((cin, units), lambda i: (0, 0)),
                pl.BlockSpec((1, units), lambda i: (0, 0)),
            ],
            out_specs=pl.BlockSpec((1, 2, units), lambda i: (i, 0, 0)),
        ),
        compiler_params=pltpu.CompilerParams(
            dimension_semantics=("parallel",),
            vmem_limit_bytes=vmem_limit),
    )(x, w, b2)

    # --- Glue: fold BN (batch mean / biased variance) + gamma/beta + bias -----
    n = jnp.float32(K * T)
    totals = jnp.sum(stats, axis=0)                      # (2, units)
    mean = totals[0] / n
    var = jnp.maximum(totals[1] / n - mean * mean, 0.0)  # biased var, clamped
    scale = gamma / jnp.sqrt(var + eps)
    shift = beta - mean * scale
    eff_w = w * scale[None, :]                           # (cin, units)
    eff_b = (b * scale + shift).reshape(1, units)        # (1, units)

    # --- Stage 2: fused linear + ReLU + max-over-T + concat + mask ------------
    out = pl.pallas_call(
        _fuse_kernel,
        out_shape=jax.ShapeDtypeStruct((kpad, T, 2 * units), jnp.float32),
        grid_spec=pltpu.PrefetchScalarGridSpec(
            num_scalar_prefetch=0,
            grid=(nblk,),
            in_specs=[
                pl.BlockSpec((bk_eff, T, cin), lambda i: (i, 0, 0)),
                pl.BlockSpec((cin, units), lambda i: (0, 0)),
                pl.BlockSpec((1, units), lambda i: (0, 0)),
                pl.BlockSpec((bk_eff, T), lambda i: (i, 0)),
            ],
            out_specs=pl.BlockSpec((bk_eff, T, 2 * units),
                                   lambda i: (i, 0, 0)),
        ),
        compiler_params=pltpu.CompilerParams(
            dimension_semantics=("parallel",),
            vmem_limit_bytes=vmem_limit),
    )(x, eff_w, eff_b, mask)

    if kpad != K:
        out = out[:K]
    return out


def vfe_reference(x, mask, w, b, gamma, beta, eps=1e-5):
    """Pure-JAX reference mirroring the PyTorch forward (training-mode BN)."""
    K, T, cin = x.shape
    units = w.shape[1]
    y = x.reshape(K * T, cin) @ w + b
    mean = jnp.mean(y, axis=0)
    var = jnp.mean((y - mean) ** 2, axis=0)
    y = (y - mean) / jnp.sqrt(var + eps) * gamma + beta
    pwf = jax.nn.relu(y).reshape(K, T, units)
    laf = jnp.broadcast_to(jnp.max(pwf, axis=1, keepdims=True), pwf.shape)
    pwcf = jnp.concatenate([pwf, laf], axis=2)
    return pwcf * mask[:, :, None]


if __name__ == "__main__":
    # Small shapes: K voxels, T points per voxel (cfg.T), cin input features,
    # cout=32 -> units = cout // 2 = 16.
    K, T, cin, cout = 16, 8, 4, 32
    units = cout // 2

    key = jax.random.PRNGKey(0)
    kx, km, kw, kb, kg, kbeta = jax.random.split(key, 6)

    x = jax.random.normal(kx, (K, T, cin), dtype=jnp.float32)
    mask = (jax.random.uniform(km, (K, T)) > 0.3).astype(jnp.float32)

    w = jax.random.normal(kw, (cin, units), dtype=jnp.float32) * 0.5
    b = jax.random.normal(kb, (units,), dtype=jnp.float32) * 0.1
    gamma = 1.0 + 0.1 * jax.random.normal(kg, (units,), dtype=jnp.float32)
    beta = 0.1 * jax.random.normal(kbeta, (units,), dtype=jnp.float32)

    out = vfe_forward(x, mask, w, b, gamma, beta)
    out = jax.block_until_ready(out)

    ref = vfe_reference(x, mask, w, b, gamma, beta)
    assert out.shape == (K, T, 2 * units)
    assert jnp.allclose(out, ref, rtol=1e-3, atol=1e-3), (
        float(jnp.max(jnp.abs(out - ref))))

    print("KERNEL_OK")
</pallas_src>

<mosaic_0001>
module attributes {stable_mosaic.version = 11 : i64} {
  func.func @_stats_kernel(%arg0: i32, %arg1: memref<16x8x4xf32, #tpu.memory_space<vmem>>, %arg2: memref<4x16xf32, #tpu.memory_space<vmem>>, %arg3: memref<1x16xf32, #tpu.memory_space<vmem>>, %arg4: memref<1x2x16xf32, #tpu.memory_space<vmem>>) attributes {dimension_semantics = [#tpu.dimension_semantics<parallel>], iteration_bounds = array<i64: 1>, scalar_prefetch = 0 : i64, scratch_operands = 0 : i64, tpu.core_type = #tpu.core_type<tc>, window_params = [{transform_indices = @transform_0, window_bounds = array<i64: 16, 8, 4>}, {pipeline_mode = #tpu.pipeline_mode<synchronous>, transform_indices = @transform_1, window_bounds = array<i64: 4, 16>}, {pipeline_mode = #tpu.pipeline_mode<synchronous>, transform_indices = @transform_2, window_bounds = array<i64: 1, 16>}, {transform_indices = @transform_3, window_bounds = array<i64: 1, 2, 16>}]} {
    %c0 = arith.constant 0 : index
    %c0_0 = arith.constant 0 : index
    %c0_1 = arith.constant 0 : index
    %0 = vector.load %arg1[%c0, %c0_0, %c0_1] : memref<16x8x4xf32, #tpu.memory_space<vmem>>, vector<16x8x4xf32>
    %c0_2 = arith.constant 0 : index
    %c0_3 = arith.constant 0 : index
    %1 = vector.load %arg2[%c0_2, %c0_3] : memref<4x16xf32, #tpu.memory_space<vmem>>, vector<4x16xf32>
    %c0_4 = arith.constant 0 : index
    %c0_5 = arith.constant 0 : index
    %2 = vector.load %arg3[%c0_4, %c0_5] : memref<1x16xf32, #tpu.memory_space<vmem>>, vector<1x16xf32>
    %3 = vector.shape_cast %2 : vector<1x16xf32> to vector<1x1x16xf32>
    %4 = vector.shape_cast %3 : vector<1x1x16xf32> to vector<1x1x16xf32>
    %5 = vector.broadcast %4 : vector<1x1x16xf32> to vector<16x8x16xf32>
    %6 = vector.extract_strided_slice %0 {offsets = [0, 0, 0], sizes = [16, 8, 1], strides = [1, 1, 1]} : vector<16x8x4xf32> to vector<16x8x1xf32>
    %7 = vector.extract_strided_slice %1 {offsets = [0, 0], sizes = [1, 16], strides = [1, 1]} : vector<4x16xf32> to vector<1x16xf32>
    %8 = vector.shape_cast %7 : vector<1x16xf32> to vector<16xf32>
    %9 = vector.shape_cast %8 : vector<16xf32> to vector<1x1x16xf32>
    %10 = vector.broadcast %6 : vector<16x8x1xf32> to vector<16x8x16xf32>
    %11 = vector.broadcast %9 : vector<1x1x16xf32> to vector<16x8x16xf32>
    %12 = arith.mulf %10, %11 : vector<16x8x16xf32>
    %13 = arith.addf %5, %12 : vector<16x8x16xf32>
    %14 = vector.extract_strided_slice %0 {offsets = [0, 0, 1], sizes = [16, 8, 1], strides = [1, 1, 1]} : vector<16x8x4xf32> to vector<16x8x1xf32>
    %15 = vector.extract_strided_slice %1 {offsets = [1, 0], sizes = [1, 16], strides = [1, 1]} : vector<4x16xf32> to vector<1x16xf32>
    %16 = vector.shape_cast %15 : vector<1x16xf32> to vector<16xf32>
    %17 = vector.shape_cast %16 : vector<16xf32> to vector<1x1x16xf32>
    %18 = vector.broadcast %14 : vector<16x8x1xf32> to vector<16x8x16xf32>
    %19 = vector.broadcast %17 : vector<1x1x16xf32> to vector<16x8x16xf32>
    %20 = arith.mulf %18, %19 : vector<16x8x16xf32>
    %21 = arith.addf %13, %20 : vector<16x8x16xf32>
    %22 = vector.extract_strided_slice %0 {offsets = [0, 0, 2], sizes = [16, 8, 1], strides = [1, 1, 1]} : vector<16x8x4xf32> to vector<16x8x1xf32>
    %23 = vector.extract_strided_slice %1 {offsets = [2, 0], sizes = [1, 16], strides = [1, 1]} : vector<4x16xf32> to vector<1x16xf32>
    %24 = vector.shape_cast %23 : vector<1x16xf32> to vector<16xf32>
    %25 = vector.shape_cast %24 : vector<16xf32> to vector<1x1x16xf32>
    %26 = vector.broadcast %22 : vector<16x8x1xf32> to vector<16x8x16xf32>
    %27 = vector.broadcast %25 : vector<1x1x16xf32> to vector<16x8x16xf32>
    %28 = arith.mulf %26, %27 : vector<16x8x16xf32>
    %29 = arith.addf %21, %28 : vector<16x8x16xf32>
    %30 = vector.extract_strided_slice %0 {offsets = [0, 0, 3], sizes = [16, 8, 1], strides = [1, 1, 1]} : vector<16x8x4xf32> to vector<16x8x1xf32>
    %31 = vector.extract_strided_slice %1 {offsets = [3, 0], sizes = [1, 16], strides = [1, 1]} : vector<4x16xf32> to vector<1x16xf32>
    %32 = vector.shape_cast %31 : vector<1x16xf32> to vector<16xf32>
    %33 = vector.shape_cast %32 : vector<16xf32> to vector<1x1x16xf32>
    %34 = vector.broadcast %30 : vector<16x8x1xf32> to vector<16x8x16xf32>
    %35 = vector.broadcast %33 : vector<1x1x16xf32> to vector<16x8x16xf32>
    %36 = arith.mulf %34, %35 : vector<16x8x16xf32>
    %37 = arith.addf %29, %36 : vector<16x8x16xf32>
    %c16_i32 = arith.constant 16 : i32
    %38 = arith.muli %arg0, %c16_i32 : i32
    %39 = tpu.iota {dimensions = array<i32: 0>} : vector<16x1x1xi32>
    %40 = vector.broadcast %38 : i32 to vector<16x1x1xi32>
    %41 = arith.addi %40, %39 : vector<16x1x1xi32>
    %c16_i32_6 = arith.constant 16 : i32
    %42 = vector.broadcast %c16_i32_6 : i32 to vector<16x1x1xi32>
    %43 = arith.cmpi slt, %41, %42 : vector<16x1x1xi32>
    %cst = arith.constant 0.000000e+00 : f32
    %44 = vector.shape_cast %43 : vector<16x1x1xi1> to vector<16x1x1xi1>
    %45 = vector.broadcast %44 : vector<16x1x1xi1> to vector<16x8x16xi1>
    %46 = vector.broadcast %cst : f32 to vector<16x8x16xf32>
    %47 = arith.select %45, %37, %46 : vector<16x8x16xi1>, vector<16x8x16xf32>
    %cst_7 = arith.constant dense<0.000000e+00> : vector<8x16xf32>
    %48 = vector.multi_reduction <add>, %47, %cst_7 [0] : vector<16x8x16xf32> to vector<8x16xf32>
    %cst_8 = arith.constant dense<0.000000e+00> : vector<16xf32>
    %49 = vector.multi_reduction <add>, %48, %cst_8 [0] : vector<8x16xf32> to vector<16xf32>
    %50 = vector.shape_cast %49 : vector<16xf32> to vector<1x16xf32>
    %51 = arith.mulf %47, %47 : vector<16x8x16xf32>
    %cst_9 = arith.constant dense<0.000000e+00> : vector<8x16xf32>
    %52 = vector.multi_reduction <add>, %51, %cst_9 [0] : vector<16x8x16xf32> to vector<8x16xf32>
    %cst_10 = arith.constant dense<0.000000e+00> : vector<16xf32>
    %53 = vector.multi_reduction <add>, %52, %cst_10 [0] : vector<8x16xf32> to vector<16xf32>
    %54 = vector.shape_cast %53 : vector<16xf32> to vector<1x16xf32>
    %55 = tpu.concatenate %50, %54 in 0 : vector<1x16xf32>, vector<1x16xf32> -> vector<2x16xf32>
    %56 = vector.shape_cast %55 : vector<2x16xf32> to vector<1x2x16xf32>
    %c0_11 = arith.constant 0 : index
    %c0_12 = arith.constant 0 : index
    %c0_13 = arith.constant 0 : index
    %57 = vector.load %arg4[%c0_11, %c0_12, %c0_13] : memref<1x2x16xf32, #tpu.memory_space<vmem>>, vector<1x2x16xf32>
    tpu.vector_store %arg4[%c0_11, %c0_12, %c0_13], %56 {strides = array<i32>} : memref<1x2x16xf32, #tpu.memory_space<vmem>>, vector<1x2x16xf32>,
    return
  }
  func.func @transform_0(%arg0: i32) -> (i32, i32, i32) {
    %c0_i32 = arith.constant 0 : i32
    %c0_i32_0 = arith.constant 0 : i32
    %c0_i32_1 = arith.constant 0 : i32
    return %arg0, %c0_i32, %c0_i32_0 : i32, i32, i32
  }
  func.func @transform_1(%arg0: i32) -> (i32, i32) {
    %c0_i32 = arith.constant 0 : i32
    %c0_i32_0 = arith.constant 0 : i32
    %c0_i32_1 = arith.constant 0 : i32
    return %c0_i32, %c0_i32_0 : i32, i32
  }
  func.func @transform_2(%arg0: i32) -> (i32, i32) {
    %c0_i32 = arith.constant 0 : i32
    %c0_i32_0 = arith.constant 0 : i32
    %c0_i32_1 = arith.constant 0 : i32
    return %c0_i32, %c0_i32_0 : i32, i32
  }
  func.func @transform_3(%arg0: i32) -> (i32, i32, i32) {
    %c0_i32 = arith.constant 0 : i32
    %c0_i32_0 = arith.constant 0 : i32
    %c0_i32_1 = arith.constant 0 : i32
    return %arg0, %c0_i32, %c0_i32_0 : i32, i32, i32
  }
}

module attributes {stable_mosaic.version = 11 : i64} {
  func.func @_fuse_kernel(%arg0: i32, %arg1: memref<16x8x4xf32, #tpu.memory_space<vmem>>, %arg2: memref<4x16xf32, #tpu.memory_space<vmem>>, %arg3: memref<1x16xf32, #tpu.memory_space<vmem>>, %arg4: memref<16x8xf32, #tpu.memory_space<vmem>>, %arg5: memref<16x8x32xf32, #tpu.memory_space<vmem>>) attributes {dimension_semantics = [#tpu.dimension_semantics<parallel>], iteration_bounds = array<i64: 1>, scalar_prefetch = 0 : i64, scratch_operands = 0 : i64, tpu.core_type = #tpu.core_type<tc>, window_params = [{transform_indices = @transform_0, window_bounds = array<i64: 16, 8, 4>}, {pipeline_mode = #tpu.pipeline_mode<synchronous>, transform_indices = @transform_1, window_bounds = array<i64: 4, 16>}, {pipeline_mode = #tpu.pipeline_mode<synchronous>, transform_indices = @transform_2, window_bounds = array<i64: 1, 16>}, {transform_indices = @transform_3, window_bounds = array<i64: 16, 8>}, {transform_indices = @transform_4, window_bounds = array<i64: 16, 8, 32>}]} {
    %c0 = arith.constant 0 : index
    %c0_0 = arith.constant 0 : index
    %c0_1 = arith.constant 0 : index
    %0 = vector.load %arg1[%c0, %c0_0, %c0_1] : memref<16x8x4xf32, #tpu.memory_space<vmem>>, vector<16x8x4xf32>
    %c0_2 = arith.constant 0 : index
    %c0_3 = arith.constant 0 : index
    %1 = vector.load %arg2[%c0_2, %c0_3] : memref<4x16xf32, #tpu.memory_space<vmem>>, vector<4x16xf32>
    %c0_4 = arith.constant 0 : index
    %c0_5 = arith.constant 0 : index
    %2 = vector.load %arg3[%c0_4, %c0_5] : memref<1x16xf32, #tpu.memory_space<vmem>>, vector<1x16xf32>
    %3 = vector.shape_cast %2 : vector<1x16xf32> to vector<1x1x16xf32>
    %4 = vector.shape_cast %3 : vector<1x1x16xf32> to vector<1x1x16xf32>
    %5 = vector.broadcast %4 : vector<1x1x16xf32> to vector<16x8x16xf32>
    %6 = vector.extract_strided_slice %0 {offsets = [0, 0, 0], sizes = [16, 8, 1], strides = [1, 1, 1]} : vector<16x8x4xf32> to vector<16x8x1xf32>
    %7 = vector.extract_strided_slice %1 {offsets = [0, 0], sizes = [1, 16], strides = [1, 1]} : vector<4x16xf32> to vector<1x16xf32>
    %8 = vector.shape_cast %7 : vector<1x16xf32> to vector<16xf32>
    %9 = vector.shape_cast %8 : vector<16xf32> to vector<1x1x16xf32>
    %10 = vector.broadcast %6 : vector<16x8x1xf32> to vector<16x8x16xf32>
    %11 = vector.broadcast %9 : vector<1x1x16xf32> to vector<16x8x16xf32>
    %12 = arith.mulf %10, %11 : vector<16x8x16xf32>
    %13 = arith.addf %5, %12 : vector<16x8x16xf32>
    %14 = vector.extract_strided_slice %0 {offsets = [0, 0, 1], sizes = [16, 8, 1], strides = [1, 1, 1]} : vector<16x8x4xf32> to vector<16x8x1xf32>
    %15 = vector.extract_strided_slice %1 {offsets = [1, 0], sizes = [1, 16], strides = [1, 1]} : vector<4x16xf32> to vector<1x16xf32>
    %16 = vector.shape_cast %15 : vector<1x16xf32> to vector<16xf32>
    %17 = vector.shape_cast %16 : vector<16xf32> to vector<1x1x16xf32>
    %18 = vector.broadcast %14 : vector<16x8x1xf32> to vector<16x8x16xf32>
    %19 = vector.broadcast %17 : vector<1x1x16xf32> to vector<16x8x16xf32>
    %20 = arith.mulf %18, %19 : vector<16x8x16xf32>
    %21 = arith.addf %13, %20 : vector<16x8x16xf32>
    %22 = vector.extract_strided_slice %0 {offsets = [0, 0, 2], sizes = [16, 8, 1], strides = [1, 1, 1]} : vector<16x8x4xf32> to vector<16x8x1xf32>
    %23 = vector.extract_strided_slice %1 {offsets = [2, 0], sizes = [1, 16], strides = [1, 1]} : vector<4x16xf32> to vector<1x16xf32>
    %24 = vector.shape_cast %23 : vector<1x16xf32> to vector<16xf32>
    %25 = vector.shape_cast %24 : vector<16xf32> to vector<1x1x16xf32>
    %26 = vector.broadcast %22 : vector<16x8x1xf32> to vector<16x8x16xf32>
    %27 = vector.broadcast %25 : vector<1x1x16xf32> to vector<16x8x16xf32>
    %28 = arith.mulf %26, %27 : vector<16x8x16xf32>
    %29 = arith.addf %21, %28 : vector<16x8x16xf32>
    %30 = vector.extract_strided_slice %0 {offsets = [0, 0, 3], sizes = [16, 8, 1], strides = [1, 1, 1]} : vector<16x8x4xf32> to vector<16x8x1xf32>
    %31 = vector.extract_strided_slice %1 {offsets = [3, 0], sizes = [1, 16], strides = [1, 1]} : vector<4x16xf32> to vector<1x16xf32>
    %32 = vector.shape_cast %31 : vector<1x16xf32> to vector<16xf32>
    %33 = vector.shape_cast %32 : vector<16xf32> to vector<1x1x16xf32>
    %34 = vector.broadcast %30 : vector<16x8x1xf32> to vector<16x8x16xf32>
    %35 = vector.broadcast %33 : vector<1x1x16xf32> to vector<16x8x16xf32>
    %36 = arith.mulf %34, %35 : vector<16x8x16xf32>
    %37 = arith.addf %29, %36 : vector<16x8x16xf32>
    %cst = arith.constant 0.000000e+00 : f32
    %38 = vector.broadcast %cst : f32 to vector<16x8x16xf32>
    %39 = arith.maximumf %37, %38 : vector<16x8x16xf32>
    %cst_6 = arith.constant dense<0xFF800000> : vector<16x16xf32>
    %40 = vector.multi_reduction <maximumf>, %39, %cst_6 [1] : vector<16x8x16xf32> to vector<16x16xf32>
    %41 = vector.shape_cast %40 : vector<16x16xf32> to vector<16x1x16xf32>
    %c0_7 = arith.constant 0 : index
    %c0_8 = arith.constant 0 : index
    %42 = vector.load %arg4[%c0_7, %c0_8] : memref<16x8xf32, #tpu.memory_space<vmem>>, vector<16x8xf32>
    %43 = vector.shape_cast %42 : vector<16x8xf32> to vector<16x8x1xf32>
    %44 = vector.broadcast %43 : vector<16x8x1xf32> to vector<16x8x16xf32>
    %45 = arith.mulf %39, %44 : vector<16x8x16xf32>
    %c0_9 = arith.constant 0 : index
    %c0_10 = arith.constant 0 : index
    %c0_11 = arith.constant 0 : index
    %46 = vector.load %arg5[%c0_9, %c0_10, %c0_11] : memref<16x8x32xf32, #tpu.memory_space<vmem>>, vector<16x8x16xf32>
    tpu.vector_store %arg5[%c0_9, %c0_10, %c0_11], %45 {strides = array<i32>} : memref<16x8x32xf32, #tpu.memory_space<vmem>>, vector<16x8x16xf32>,
    %47 = vector.broadcast %41 : vector<16x1x16xf32> to vector<16x8x16xf32>
    %48 = vector.broadcast %43 : vector<16x8x1xf32> to vector<16x8x16xf32>
    %49 = arith.mulf %47, %48 : vector<16x8x16xf32>
    %c0_12 = arith.constant 0 : index
    %c0_13 = arith.constant 0 : index
    %c16 = arith.constant 16 : index
    %50 = vector.load %arg5[%c0_12, %c0_13, %c16] : memref<16x8x32xf32, #tpu.memory_space<vmem>>, vector<16x8x16xf32>
    tpu.vector_store %arg5[%c0_12, %c0_13, %c16], %49 {strides = array<i32>} : memref<16x8x32xf32, #tpu.memory_space<vmem>>, vector<16x8x16xf32>,
    return
  }
  func.func @transform_0(%arg0: i32) -> (i32, i32, i32) {
    %c0_i32 = arith.constant 0 : i32
    %c0_i32_0 = arith.constant 0 : i32
    %c0_i32_1 = arith.constant 0 : i32
    return %arg0, %c0_i32, %c0_i32_0 : i32, i32, i32
  }
  func.func @transform_1(%arg0: i32) -> (i32, i32) {
    %c0_i32 = arith.constant 0 : i32
    %c0_i32_0 = arith.constant 0 : i32
    %c0_i32_1 = arith.constant 0 : i32
    return %c0_i32, %c0_i32_0 : i32, i32
  }
  func.func @transform_2(%arg0: i32) -> (i32, i32) {
    %c0_i32 = arith.constant 0 : i32
    %c0_i32_0 = arith.constant 0 : i32
    %c0_i32_1 = arith.constant 0 : i32
    return %c0_i32, %c0_i32_0 : i32, i32
  }
  func.func @transform_3(%arg0: i32) -> (i32, i32) {
    %c0_i32 = arith.constant 0 : i32
    %c0_i32_0 = arith.constant 0 : i32
    return %arg0, %c0_i32 : i32, i32
  }
  func.func @transform_4(%arg0: i32) -> (i32, i32, i32) {
    %c0_i32 = arith.constant 0 : i32
    %c0_i32_0 = arith.constant 0 : i32
    %c0_i32_1 = arith.constant 0 : i32
    return %arg0, %c0_i32, %c0_i32_0 : i32, i32, i32
  }
}

</mosaic_0001>

<bundles_post_ra>
// kernel: vfe_forward.2
= control target key start
LH: loop header
LB: loop body
LE: loop exit
PB: predicated region body
PF: predicated region fallthrough
CT: control target
= control target key end

     0   :  { %v659_v0 = vmov 0   ;;  %v660_v17 = vmov 1   ;;  %v661_v18 = vmov 2   ;;  %v662_v19 = vmov 3   ;;  %s1009_s0 = inlined_call_operand.vmem [shape: f32[16,8,4], index: 0, kind: input, shape index: {}]   ;;  %s1010_s1 = inlined_call_operand.vmem [shape: f32[4,16], index: 1, kind: input, shape index: {}]   ;;  %s1011_s2 = inlined_call_operand.vmem [shape: f32[1,16], index: 2, kind: input, shape index: {}]   ;;  %s1012_s3 = inlined_call_operand.vmem [shape: f32[1,2,16], index: 3, kind: output, shape index: {}]  }
   0x1   :  { %642 = vset.pattern.permute.xlu1 %v659_v0  ;;  %641 = vset.pattern.permute.xlu0 %v659_v0  ;;  %v686_v1 = vld [vmem:[%s1009_s0 + $0x10] sm:$0xff]  ;;  %v14_v2 = vld [vmem:[%s1009_s0] sm:$0xff]  ;;  %v17_v3 = vld [vmem:[%s1009_s0 + $0x18] sm:$0xff]  ;;  %v118_v28 = vlaneseq  ;;  %vm535_vm0 = vcmask 130048   ;;  %vm628_vm1 = vcmask 1040384   ;;  %vm630_vm2 = vcmask 123904  }
   0x2   :  { %50 = vperm.xlu1 %642, %v686_v1   ;;  %40 = vperm.xlu0 %641, %v14_v2   ;;  %v15_v4 = vld [vmem:[%s1009_s0 + $0x8] sm:$0xff]  ;;  %v18_v6 = vld [vmem:[%s1009_s0 + $0x20] sm:$0xff]  ;;  %v21_v7 = vld [vmem:[%s1009_s0 + $0x38] sm:$0xff] }
   0x3   :  { %v701_v5 = vld [vmem:[%s1009_s0 + $0x28] sm:$0xff]  ;;  %v713_v8 = vld [vmem:[%s1009_s0 + $0x30] sm:$0xff]  ;;  %v724_v10 = vld [vmem:[%s1009_s0 + $0x40] sm:$0xff]  ;;  %v797_v31 = vshrl.u32 %v118_v28, 7 }
   0x4   :  { %v719_v9 = vld [vmem:[%s1009_s0 + $0x48] sm:$0xff]  ;;  %v731_v11 = vld [vmem:[%s1009_s0 + $0x58] sm:$0xff]  ;;  %v24_v12 = vld [vmem:[%s1009_s0 + $0x50] sm:$0xff] }
   0x5   :  { %v27_v13 = vld [vmem:[%s1009_s0 + $0x68] sm:$0xff]  ;;  %v743_v14 = vld [vmem:[%s1009_s0 + $0x60] sm:$0xff]  ;;  %v749_v15 = vld [vmem:[%s1009_s0 + $0x78] sm:$0xff]  ;;  %v120_v34 = vsub.s32 0, %v797_v31  ;;  %v220_v39 = vsub.s32 1, %v797_v31 }
   0x6   :  { %55 = vperm.xlu1 %642, %v17_v3   ;;  %45 = vperm.xlu0 %641, %v15_v4   ;;  %v754_v16 = vld [vmem:[%s1009_s0 + $0x70] sm:$0xff]  ;;  %v806_v35 = vld [vmem:[%s1010_s1] sm:$0xf] }
   0x7   :  { %v812_v38 = vrot.slane %v806_v35, %v120_v34  ;;  %v820_v43 = vrot.slane %v806_v35, %v220_v39  ;;  %v825_v44 = vld [vmem:[%s1011_s2] ss:$0 sm:$0xff] }
   0xa   :  { %65 = vperm.xlu1 %642, %v701_v5   ;;  %60 = vperm.xlu0 %641, %v18_v6  }
   0xe   :  { %75 = vperm.xlu1 %642, %v21_v7   ;;  %70 = vperm.xlu0 %641, %v713_v8  }
  0x12   :  { %85 = vperm.xlu1 %642, %v719_v9   ;;  %80 = vperm.xlu0 %641, %v724_v10  }
  0x16   :  { %95 = vperm.xlu1 %642, %v731_v11   ;;  %90 = vperm.xlu0 %641, %v24_v12  }
  0x1a   :  { %105 = vperm.xlu1 %642, %v27_v13   ;;  %100 = vperm.xlu0 %641, %v743_v14  }
  0x1e   :  { %115 = vperm.xlu1 %642, %v749_v15   ;;  %110 = vperm.xlu0 %641, %v754_v16  }
  0x22   :  { %644 = vset.pattern.permute.xlu1 %v660_v17  ;;  %643 = vset.pattern.permute.xlu0 %v660_v17 }
  0x23   :  { %159 = vperm.xlu1 %644, %v15_v4   ;;  %155 = vperm.xlu0 %643, %v14_v2  }
  0x27   :  { %163 = vperm.xlu1 %644, %v686_v1   ;;  %167 = vperm.xlu0 %643, %v17_v3  }
  0x2b   :  { %171 = vperm.xlu1 %644, %v18_v6   ;;  %175 = vperm.xlu0 %643, %v701_v5  }
  0x2f   :  { %179 = vperm.xlu1 %644, %v713_v8   ;;  %183 = vperm.xlu0 %643, %v21_v7  }
  0x33   :  { %187 = vperm.xlu1 %644, %v724_v10   ;;  %191 = vperm.xlu0 %643, %v719_v9  }
  0x37   :  { %195 = vperm.xlu1 %644, %v24_v12   ;;  %199 = vperm.xlu0 %643, %v731_v11  }
  0x3b   :  { %203 = vperm.xlu1 %644, %v743_v14   ;;  %207 = vperm.xlu0 %643, %v27_v13  }
  0x3f   :  { %211 = vperm.xlu1 %644, %v754_v16   ;;  %215 = vperm.xlu0 %643, %v749_v15  }
  0x43   :  { %645 = vset.pattern.permute.xlu1 %v661_v18  ;;  %646 = vset.pattern.permute.xlu0 %v661_v18 }
  0x44   :  { %255 = vperm.xlu1 %645, %v14_v2   ;;  %259 = vperm.xlu0 %646, %v15_v4  }
  0x48   :  { %263 = vperm.xlu1 %645, %v686_v1   ;;  %647 = vset.pattern.permute.xlu0 %v662_v19 }
  0x49   :  { %355 = vperm.xlu0 %647, %v14_v2  }
  0x4c   :  { %267 = vperm.xlu1 %645, %v17_v3  }
  0x4d   :  { %371 = vperm.xlu0 %647, %v18_v6  }
  0x50   :  { %648 = vset.pattern.permute.xlu1 %v662_v19 }
  0x51   :  { %359 = vperm.xlu1 %648, %v15_v4   ;;  %383 = vperm.xlu0 %647, %v21_v7  }
  0x55   :  { %363 = vperm.xlu1 %648, %v686_v1   ;;  %395 = vperm.xlu0 %647, %v24_v12  }
  0x59   :  { %367 = vperm.xlu1 %648, %v17_v3   ;;  %654 = vset.pattern.permute.xlu0 %v661_v18 }
  0x5a   :  { %271 = vperm.xlu0 %654, %v18_v6  }
  0x5d   :  { %649 = vset.pattern.permute.xlu1 %v661_v18 }
  0x5e   :  { %275 = vperm.xlu1 %649, %v701_v5   ;;  %283 = vperm.xlu0 %654, %v21_v7  }
  0x62   :  { %279 = vperm.xlu1 %649, %v713_v8   ;;  %295 = vperm.xlu0 %654, %v24_v12  }
  0x66   :  { %650 = vset.pattern.permute.xlu1 %v662_v19  ;;  %307 = vperm.xlu0 %654, %v27_v13  }
  0x67   :  { %375 = vperm.xlu1 %650, %v701_v5  }
  0x6a   :  { %657 = vset.pattern.permute.xlu0 %v662_v19 }
  0x6b   :  { %379 = vperm.xlu1 %650, %v713_v8   ;;  %407 = vperm.xlu0 %657, %v27_v13  }
  0x6f   :  { %651 = vset.pattern.permute.xlu1 %v661_v18  ;;  %415 = vperm.xlu0 %657, %v749_v15  }
  0x70   :  { %287 = vperm.xlu1 %651, %v724_v10  }
  0x74   :  { %291 = vperm.xlu1 %651, %v719_v9  }
  0x78   :  { %652 = vset.pattern.permute.xlu1 %v662_v19 }
  0x79   :  { %387 = vperm.xlu1 %652, %v724_v10  }
  0x7d   :  { %v51_v20 = vpop.permute.xlu1 %50  ;;  %391 = vperm.xlu1 %652, %v719_v9   ;;  %v783_v21 = vpop.permute.xlu0 %40 }
  0x7e   :  { %v124_v48 = vmul.f32 %v812_v38, %v51_v20  ;;  %v122_v39 = vmul.f32 %v812_v38, %v783_v21 }
  0x80   :  { %v140_v54 = vadd.f32 %v825_v44, %v124_v48  ;;  %v138_v48 = vadd.f32 %v825_v44, %v122_v39 }
  0x81   :  { %v785_v22 = vpop.permute.xlu1 %55  ;;  %653 = vset.pattern.permute.xlu1 %v661_v18  ;;  %v46_v23 = vpop.permute.xlu0 %45 }
  0x82   :  { %299 = vperm.xlu1 %653, %v731_v11   ;;  %v123_v40 = vmul.f32 %v812_v38, %v46_v23 }
  0x84   :  { %v139_v45 = vadd.f32 %v825_v44, %v123_v40 }
  0x85   :  { %v788_v24 = vpop.permute.xlu1 %65  ;;  %v61_v25 = vpop.permute.xlu0 %60 }
  0x86   :  { %303 = vperm.xlu1 %653, %v743_v14   ;;  %v126_v50 = vmul.f32 %v812_v38, %v61_v25 }
  0x88   :  { %v142_v56 = vadd.f32 %v825_v44, %v126_v50 }
  0x89   :  { %v791_v26 = vpop.permute.xlu1 %75  ;;  %v71_v27 = vpop.permute.xlu0 %70 }
  0x8a   :  { %655 = vset.pattern.permute.xlu1 %v662_v19  ;;  %v128_v57 = vmul.f32 %v812_v38, %v71_v27 }
  0x8b   :  { %399 = vperm.xlu1 %655, %v731_v11  }
  0x8c   :  { %v144_v62 = vadd.f32 %v825_v44, %v128_v57 }
  0x8d   :  { %v795_v29 = vpop.permute.xlu1 %85  ;;  %v81_v30 = vpop.permute.xlu0 %80 }
  0x8e   :  { %v130_v2 = vmul.f32 %v812_v38, %v81_v30 }
  0x8f   :  { %403 = vperm.xlu1 %655, %v743_v14  }
  0x90   :  { %v146_v7 = vadd.f32 %v825_v44, %v130_v2 }
  0x91   :  { %v800_v32 = vpop.permute.xlu1 %95  ;;  %v91_v33 = vpop.permute.xlu0 %90 }
  0x92   :  { %v132_v8 = vmul.f32 %v812_v38, %v91_v33 }
  0x93   :  { %656 = vset.pattern.permute.xlu1 %v661_v18 }
  0x94   :  { %311 = vperm.xlu1 %656, %v754_v16   ;;  %v148_v13 = vadd.f32 %v825_v44, %v132_v8 }
  0x95   :  { %v809_v36 = vpop.permute.xlu1 %105  ;;  %v101_v37 = vpop.permute.xlu0 %100 }
  0x96   :  { %v134_v14 = vmul.f32 %v812_v38, %v101_v37  ;;  %v320_v37 = vsub.s32 2, %v797_v31 }
  0x98   :  { %315 = vperm.xlu1 %656, %v749_v15  }
  0x99   :  { %v817_v41 = vpop.permute.xlu1 %115  ;;  %v111_v42 = vpop.permute.xlu0 %110 }
  0x9a   :  { %v136_v20 = vmul.f32 %v812_v38, %v111_v42 }
  0x9c   :  { %658 = vset.pattern.permute.xlu1 %v662_v19  ;;  %v150_v19 = vadd.f32 %v825_v44, %v134_v14  ;;  %v152_v30 = vadd.f32 %v825_v44, %v136_v20 }
  0x9d   :  { %411 = vperm.xlu1 %658, %v754_v16  }
  0x9e   :  { %v160_v46 = vpop.permute.xlu1 %159  ;;  %v156_v47 = vpop.permute.xlu0 %155 }
  0x9f   :  { %v223_v49 = vmul.f32 %v820_v43, %v160_v46  ;;  %v887_v46 = vrot.slane %v806_v35, %v320_v37 }
  0xa1   :  { %v833_v51 = vadd.f32 %v223_v49, %v139_v45  ;;  %v420_v45 = vsub.s32 3, %v797_v31  ;;  %v222_v49 = vmul.f32 %v820_v43, %v156_v47 }
  0xa2   :  { %v164_v52 = vpop.permute.xlu1 %163  ;;  %v835_v53 = vpop.permute.xlu0 %167 }
  0xa3   :  { %v224_v55 = vmul.f32 %v820_v43, %v164_v52  ;;  %v892_v52 = vrot.slane %v806_v35, %v420_v45 }
  0xa5   :  { %v841_v58 = vadd.f32 %v224_v55, %v140_v54 }
  0xa6   :  { %v172_v59 = vpop.permute.xlu1 %171  ;;  %v843_v60 = vpop.permute.xlu0 %175 }
  0xa7   :  { %v226_v61 = vmul.f32 %v820_v43, %v172_v59 }
  0xa9   :  { %v847_v63 = vadd.f32 %v226_v61, %v142_v56  ;;  %v238_v56 = vadd.f32 %v222_v49, %v138_v48 }
  0xaa   :  { %v180_v0 = vpop.permute.xlu1 %179  ;;  %v849_v1 = vpop.permute.xlu0 %183 }
  0xab   :  { %v228_v3 = vmul.f32 %v820_v43, %v180_v0  ;;  %v125_v0 = vmul.f32 %v812_v38, %v785_v22 }
  0xad   :  { %v853_v4 = vadd.f32 %v228_v3, %v144_v62 }
  0xae   :  { %v188_v5 = vpop.permute.xlu1 %187  ;;  %v855_v6 = vpop.permute.xlu0 %191 }
  0xaf   :  { %v230_v9 = vmul.f32 %v820_v43, %v188_v5 }
  0xb1   :  { %v860_v10 = vadd.f32 %v230_v9, %v146_v7  ;;  %v225_v7 = vmul.f32 %v820_v43, %v835_v53 }
  0xb2   :  { %v196_v11 = vpop.permute.xlu1 %195  ;;  %v862_v12 = vpop.permute.xlu0 %199 }
  0xb3   :  { %v232_v15 = vmul.f32 %v820_v43, %v196_v11  ;;  %v141_v11 = vadd.f32 %v825_v44, %v125_v0  ;;  %v129_v0 = vmul.f32 %v812_v38, %v791_v26 }
  0xb5   :  { %v867_v16 = vadd.f32 %v232_v15, %v148_v13  ;;  %v241_v53 = vadd.f32 %v225_v7, %v141_v11  ;;  %v229_v7 = vmul.f32 %v820_v43, %v849_v1  ;;  %v227_v11 = vmul.f32 %v820_v43, %v843_v60 }
  0xb6   :  { %v204_v17 = vpop.permute.xlu1 %203  ;;  %v869_v18 = vpop.permute.xlu0 %207 }
  0xb7   :  { %v234_v23 = vmul.f32 %v820_v43, %v204_v17 }
  0xb9   :  { %v874_v25 = vadd.f32 %v234_v23, %v150_v19 }
  0xba   :  { %v212_v27 = vpop.permute.xlu1 %211  ;;  %v876_v28 = vpop.permute.xlu0 %215 }
  0xbb   :  { %v236_v33 = vmul.f32 %v820_v43, %v212_v27 }
  0xbd   :  { %v880_v34 = vadd.f32 %v236_v33, %v152_v30 }
  0xbf   :  { %v256_v40 = vpop.permute.xlu1 %255  ;;  %v260_v42 = vpop.permute.xlu0 %259 }
  0xc0   :  { %v322_v55 = vmul.f32 %v887_v46, %v256_v40  ;;  %v323_v61 = vmul.f32 %v887_v46, %v260_v42 }
  0xc2   :  { %v338_v31 = vadd.f32 %v322_v55, %v238_v56  ;;  %v339_v3 = vadd.f32 %v323_v61, %v833_v51 }
  0xc3   :  { %v264_v50 = vpop.permute.xlu1 %263 }
  0xc4   :  { %v356_v54 = vpop.permute.xlu0 %355  ;;  %v324_v47 = vmul.f32 %v887_v46, %v264_v50 }
  0xc5   :  { %v422_v21 = vmul.f32 %v892_v52, %v356_v54 }
  0xc6   :  { %v340_v13 = vadd.f32 %v324_v47, %v841_v58 }
  0xc7   :  { %v268_v57 = vpop.permute.xlu1 %267  ;;  %v438_v62 = vadd.f32 %v422_v21, %v338_v31 }
  0xc8   :  { %v372_v59 = vpop.permute.xlu0 %371  ;;  %v325_v22 = vmul.f32 %v887_v46, %v268_v57 }
  0xc9   :  { %v574_v8 = vmul.f32 %v438_v62, %v438_v62  ;;  %v536_v17 = vsel %vm535_vm0, %v438_v62, 0.0  ;;  %v426_v49 = vmul.f32 %v892_v52, %v372_v59  ;;  %v127_v59 = vmul.f32 %v812_v38, %v788_v24 }
  0xca   :  { %v341_v39 = vadd.f32 %v325_v22, %v241_v53  ;;  %v145_v22 = vadd.f32 %v825_v44, %v129_v0 }
  0xcb   :  { %v590_v27 = vsel %vm535_vm0, %v574_v8, 0.0 }
  0xcc   :  { %v360_v2 = vpop.permute.xlu1 %359  ;;  %v384_v35 = vpop.permute.xlu0 %383 }
  0xcd   :  { %v423_v5 = vmul.f32 %v892_v52, %v360_v2 }
  0xcf   :  { %v439_v9 = vadd.f32 %v423_v5, %v339_v3 }
  0xd0   :  { %v364_v14 = vpop.permute.xlu1 %363  ;;  %v907_v15 = vpop.permute.xlu0 %395 }
  0xd1   :  { %v537_v51 = vsel %vm535_vm0, %v439_v9, 0.0  ;;  %v575_v19 = vmul.f32 %v439_v9, %v439_v9  ;;  %v424_v20 = vmul.f32 %v892_v52, %v364_v14 }
  0xd2   :  { %v538_v23 = vadd.f32 %v537_v51, %v536_v17  ;;  %v143_v17 = vadd.f32 %v825_v44, %v127_v59 }
  0xd3   :  { %v591_v30 = vsel %vm535_vm0, %v575_v19, 0.0  ;;  %v440_v33 = vadd.f32 %v424_v20, %v340_v13  ;;  %v245_v19 = vadd.f32 %v229_v7, %v145_v22  ;;  %v131_v7 = vmul.f32 %v812_v38, %v795_v29 }
  0xd4   :  { %v592_v58 = vadd.f32 %v591_v30, %v590_v27  ;;  %v368_v37 = vpop.permute.xlu1 %367  ;;  %v243_v20 = vadd.f32 %v227_v11, %v143_v17 }
  0xd5   :  { %v539_v40 = vsel %vm535_vm0, %v440_v33, 0.0  ;;  %v576_v42 = vmul.f32 %v440_v33, %v440_v33  ;;  %v425_v45 = vmul.f32 %v892_v52, %v368_v37  ;;  %v272_v48 = vpop.permute.xlu0 %271 }
  0xd6   :  { %v540_v50 = vadd.f32 %v539_v40, %v538_v23  ;;  %v326_v54 = vmul.f32 %v887_v46, %v272_v48  ;;  %v429_v23 = vmul.f32 %v892_v52, %v384_v35 }
  0xd7   :  { %v593_v55 = vsel %vm535_vm0, %v576_v42, 0.0  ;;  %v441_v56 = vadd.f32 %v425_v45, %v341_v39 }
  0xd8   :  { %v594_v21 = vadd.f32 %v593_v55, %v592_v58  ;;  %v342_v57 = vadd.f32 %v326_v54, %v847_v63 }
  0xd9   :  { %v541_v31 = vsel %vm535_vm0, %v441_v56, 0.0  ;;  %v577_v61 = vmul.f32 %v441_v56, %v441_v56  ;;  %v276_v62 = vpop.permute.xlu1 %275  ;;  %v284_v5 = vpop.permute.xlu0 %283 }
  0xda   :  { %v542_v47 = vadd.f32 %v541_v31, %v540_v50  ;;  %v442_v2 = vadd.f32 %v426_v49, %v342_v57  ;;  %v329_v24 = vmul.f32 %v887_v46, %v284_v5  ;;  %v327_v51 = vmul.f32 %v887_v46, %v276_v62 }
  0xdb   :  { %v595_v3 = vsel %vm535_vm0, %v577_v61, 0.0 }
  0xdc   :  { %v596_v8 = vadd.f32 %v595_v3, %v594_v21  ;;  %v543_v63 = vsel %vm535_vm0, %v442_v2, 0.0  ;;  %v578_v9 = vmul.f32 %v442_v2, %v442_v2  ;;  %v345_v53 = vadd.f32 %v329_v24, %v245_v19 }
  0xdd   :  { %v280_v13 = vpop.permute.xlu1 %279  ;;  %v544_v26 = vadd.f32 %v543_v63, %v542_v47  ;;  %v343_v60 = vadd.f32 %v327_v51, %v243_v20  ;;  %v296_v62 = vpop.permute.xlu0 %295  ;;  %v231_v63 = vmul.f32 %v820_v43, %v855_v6 }
  0xde   :  { %v597_v14 = vsel %vm535_vm0, %v578_v9, 0.0  ;;  %v328_v30 = vmul.f32 %v887_v46, %v280_v13  ;;  %v445_v37 = vadd.f32 %v429_v23, %v345_v53  ;;  %v332_v3 = vmul.f32 %v887_v46, %v296_v62 }
  0xdf   :  { %v598_v1 = vadd.f32 %v597_v14, %v596_v8  ;;  %v432_v9 = vmul.f32 %v892_v52, %v907_v15 }
  0xe0   :  { %v344_v40 = vadd.f32 %v328_v30, %v853_v4  ;;  %v581_v55 = vmul.f32 %v445_v37, %v445_v37  ;;  %v549_v61 = vsel %vm535_vm0, %v445_v37, 0.0  ;;  %v348_v11 = vadd.f32 %v332_v3, %v867_v16 }
  0xe2   :  { %v376_v27 = vpop.permute.xlu1 %375  ;;  %v603_v2 = vsel %vm535_vm0, %v581_v55, 0.0  ;;  %v448_v51 = vadd.f32 %v432_v9, %v348_v11  ;;  %v235_v55 = vmul.f32 %v820_v43, %v869_v18 }
  0xe3   :  { %v427_v33 = vmul.f32 %v892_v52, %v376_v27 }
  0xe5   :  { %v443_v58 = vadd.f32 %v427_v33, %v343_v60  ;;  %v308_v60 = vpop.permute.xlu0 %307 }
  0xe6   :  { %v380_v39 = vpop.permute.xlu1 %379 }
  0xe7   :  { %v545_v42 = vsel %vm535_vm0, %v443_v58, 0.0  ;;  %v579_v45 = vmul.f32 %v443_v58, %v443_v58  ;;  %v428_v48 = vmul.f32 %v892_v52, %v380_v39  ;;  %v133_v39 = vmul.f32 %v812_v38, %v800_v32 }
  0xe8   :  { %v546_v49 = vadd.f32 %v545_v42, %v544_v26  ;;  %v147_v26 = vadd.f32 %v825_v44, %v131_v7 }
  0xe9   :  { %v599_v35 = vsel %vm535_vm0, %v579_v45, 0.0  ;;  %v444_v50 = vadd.f32 %v428_v48, %v344_v40  ;;  %v555_v40 = vsel %vm535_vm0, %v448_v51, 0.0  ;;  %v135_v45 = vmul.f32 %v812_v38, %v809_v36 }
  0xea   :  { %v600_v54 = vadd.f32 %v599_v35, %v598_v1  ;;  %v247_v29 = vadd.f32 %v231_v63, %v147_v26  ;;  %v233_v35 = vmul.f32 %v820_v43, %v862_v12  ;;  %v149_v32 = vadd.f32 %v825_v44, %v133_v39 }
  0xeb   :  { %v547_v56 = vsel %vm535_vm0, %v444_v50, 0.0  ;;  %v580_v21 = vmul.f32 %v444_v50, %v444_v50  ;;  %v288_v57 = vpop.permute.xlu1 %287  ;;  %v335_v36 = vmul.f32 %v887_v46, %v308_v60 }
  0xec   :  { %v548_v31 = vadd.f32 %v547_v56, %v546_v49  ;;  %v330_v8 = vmul.f32 %v887_v46, %v288_v57 }
  0xed   :  { %v601_v4 = vsel %vm535_vm0, %v580_v21, 0.0  ;;  %v408_v21 = vpop.permute.xlu0 %407 }
  0xee   :  { %v602_v0 = vadd.f32 %v601_v4, %v600_v54  ;;  %v550_v47 = vadd.f32 %v549_v61, %v548_v31  ;;  %v346_v22 = vadd.f32 %v330_v8, %v860_v10  ;;  %v584_v10 = vmul.f32 %v448_v51, %v448_v51 }
  0xef   :  { %v292_v59 = vpop.permute.xlu1 %291  ;;  %v151_v31 = vadd.f32 %v825_v44, %v135_v45  ;;  %v249_v61 = vadd.f32 %v233_v35, %v149_v32  ;;  %v435_v12 = vmul.f32 %v892_v52, %v408_v21 }
  0xf0   :  { %v604_v5 = vadd.f32 %v603_v2, %v602_v0  ;;  %v331_v14 = vmul.f32 %v887_v46, %v292_v59  ;;  %v609_v50 = vsel %vm535_vm0, %v584_v10, 0.0 }
  0xf1   :  { %v251_v62 = vadd.f32 %v235_v55, %v151_v31 }
  0xf2   :  { %v347_v19 = vadd.f32 %v331_v14, %v247_v29 }
  0xf3   :  { %v351_v2 = vadd.f32 %v335_v36, %v251_v62 }
  0xf4   :  { %v388_v13 = vpop.permute.xlu1 %387 }
  0xf5   :  { %v430_v24 = vmul.f32 %v892_v52, %v388_v13  ;;  %v451_v3 = vadd.f32 %v435_v12, %v351_v2 }
  0xf7   :  { %v446_v17 = vadd.f32 %v430_v24, %v346_v22  ;;  %v137_v22 = vmul.f32 %v812_v38, %v817_v41  ;;  %v587_v24 = vmul.f32 %v451_v3, %v451_v3 }
  0xf8   :  { %v392_v1 = vpop.permute.xlu1 %391 }
  0xf9   :  { %v551_v6 = vsel %vm535_vm0, %v446_v17, 0.0  ;;  %v582_v20 = vmul.f32 %v446_v17, %v446_v17  ;;  %v431_v15 = vmul.f32 %v892_v52, %v392_v1  ;;  %v615_v38 = vsel %vm535_vm0, %v587_v24, 0.0 }
  0xfa   :  { %v552_v16 = vadd.f32 %v551_v6, %v550_v47 }
  0xfb   :  { %v605_v23 = vsel %vm535_vm0, %v582_v20, 0.0  ;;  %v447_v53 = vadd.f32 %v431_v15, %v347_v19  ;;  %v561_v19 = vsel %vm535_vm0, %v451_v3, 0.0  ;;  %v153_v20 = vadd.f32 %v825_v44, %v137_v22 }
  0xfc   :  { %v606_v27 = vadd.f32 %v605_v23, %v604_v5 }
  0xfd   :  { %v553_v30 = vsel %vm535_vm0, %v447_v53, 0.0  ;;  %v583_v33 = vmul.f32 %v447_v53, %v447_v53  ;;  %v300_v58 = vpop.permute.xlu1 %299 }
  0xfe   :  { %v554_v37 = vadd.f32 %v553_v30, %v552_v16  ;;  %v333_v57 = vmul.f32 %v887_v46, %v300_v58  ;;  %v416_v16 = vpop.permute.xlu0 %415 }
  0xff   :  { %v607_v42 = vsel %vm535_vm0, %v583_v33, 0.0 }
 0x100   :  { %v608_v48 = vadd.f32 %v607_v42, %v606_v27  ;;  %v556_v49 = vadd.f32 %v555_v40, %v554_v37  ;;  %v349_v0 = vadd.f32 %v333_v57, %v249_v61 }
 0x101   :  { %v304_v54 = vpop.permute.xlu1 %303 }
 0x102   :  { %v610_v56 = vadd.f32 %v609_v50, %v608_v48  ;;  %v334_v47 = vmul.f32 %v887_v46, %v304_v54 }
 0x104   :  { %v350_v7 = vadd.f32 %v334_v47, %v874_v25  ;;  %v237_v25 = vmul.f32 %v820_v43, %v876_v28  ;;  %v437_v43 = vmul.f32 %v892_v52, %v416_v16 }
 0x106   :  { %v400_v4 = vpop.permute.xlu1 %399  ;;  %v253_v53 = vadd.f32 %v237_v25, %v153_v20 }
 0x107   :  { %v433_v18 = vmul.f32 %v892_v52, %v400_v4 }
 0x109   :  { %v449_v59 = vadd.f32 %v433_v18, %v349_v0 }
 0x10a   :  { %v404_v5 = vpop.permute.xlu1 %403 }
 0x10b   :  { %v557_v8 = vsel %vm535_vm0, %v449_v59, 0.0  ;;  %v585_v63 = vmul.f32 %v449_v59, %v449_v59  ;;  %v434_v9 = vmul.f32 %v892_v52, %v404_v5 }
 0x10c   :  { %v558_v11 = vadd.f32 %v557_v8, %v556_v49 }
 0x10d   :  { %v611_v13 = vsel %vm535_vm0, %v585_v63, 0.0  ;;  %v450_v26 = vadd.f32 %v434_v9, %v350_v7 }
 0x10e   :  { %v612_v14 = vadd.f32 %v611_v13, %v610_v56 }
 0x10f   :  { %v559_v29 = vsel %vm535_vm0, %v450_v26, 0.0  ;;  %v586_v17 = vmul.f32 %v450_v26, %v450_v26  ;;  %v312_v51 = vpop.permute.xlu1 %311 }
 0x110   :  { %v560_v1 = vadd.f32 %v559_v29, %v558_v11  ;;  %v336_v60 = vmul.f32 %v887_v46, %v312_v51 }
 0x111   :  { %v613_v6 = vsel %vm535_vm0, %v586_v17, 0.0 }
 0x112   :  { %v614_v15 = vadd.f32 %v613_v6, %v612_v14  ;;  %v562_v23 = vadd.f32 %v561_v19, %v560_v1  ;;  %v352_v33 = vadd.f32 %v336_v60, %v880_v34 }
 0x113   :  { %v316_v41 = vpop.permute.xlu1 %315 }
 0x114   :  { %v337_v27 = vmul.f32 %v887_v46, %v316_v41  ;;  %v616_v10 = vadd.f32 %v615_v38, %v614_v15 }
 0x116   :  { %v353_v28 = vadd.f32 %v337_v27, %v253_v53 }
 0x118   :  { %v412_v30 = vpop.permute.xlu1 %411  ;;  %v453_v58 = vadd.f32 %v437_v43, %v353_v28 }
 0x119   :  { %v436_v44 = vmul.f32 %v892_v52, %v412_v30 }
 0x11a   :  { %v589_v39 = vmul.f32 %v453_v58, %v453_v58  ;;  %v565_v48 = vsel %vm535_vm0, %v453_v58, 0.0 }
 0x11b   :  { %v452_v37 = vadd.f32 %v436_v44, %v352_v33 }
 0x11c   :  { %v619_v50 = vsel %vm535_vm0, %v589_v39, 0.0 }
 0x11d   :  { %v563_v40 = vsel %vm535_vm0, %v452_v37, 0.0  ;;  %v588_v42 = vmul.f32 %v452_v37, %v452_v37 }
 0x11e   :  { %v564_v45 = vadd.f32 %v563_v40, %v562_v23 }
 0x11f   :  { %v617_v49 = vsel %vm535_vm0, %v588_v42, 0.0 }
 0x120   :  { %v566_v46 = vadd.f32 %v565_v48, %v564_v45  ;;  %v618_v35 = vadd.f32 %v617_v49, %v616_v10 }
 0x122   :  { %v567_v54 = vsel %vm535_vm0, %v566_v46, 0.0  ;;  %v620_v34 = vadd.f32 %v619_v50, %v618_v35 }
 0x123   :  { %v568_v55 = vrot.slane %v567_v54, 4 }
 0x124   :  { %v621_v52 = vsel %vm535_vm0, %v620_v34, 0.0 }
 0x125   :  { %v569_v56 = vadd.f32 %v568_v55, %v567_v54  ;;  %v622_v32 = vrot.slane %v621_v52, 4 }
 0x127   :  { %v570_v21 = vrot.slane %v569_v56, 2  ;;  %v623_v57 = vadd.f32 %v622_v32, %v621_v52 }
 0x129   :  { %v571_v31 = vadd.f32 %v570_v21, %v569_v56  ;;  %v624_v36 = vrot.slane %v623_v57, 2 }
 0x12b   :  { %v572_v61 = vrot.slane %v571_v31, 1  ;;  %v625_v62 = vadd.f32 %v624_v36, %v623_v57 }
 0x12d   :  { %v626_v12 = vrot.slane %v625_v62, 1  ;;  %v573_v4 = vadd.f32 %v572_v61, %v571_v31 }
 0x12f   :  { %v627_v0 = vadd.f32 %v626_v12, %v625_v62 }
 0x131   :  { %v629_v47 = vsel %vm628_vm1, %v573_v4, %v627_v0 }
 0x132   :  { %631 = vst.msk [vmem:[%s1012_s3] sm:$0x3] %vm630_vm2, %v629_v47 }

// kernel: vfe_forward.3
= control target key start
LH: loop header
LB: loop body
LE: loop exit
PB: predicated region body
PF: predicated region fallthrough
CT: control target
= control target key end

     0   :  { %v885_v2 = vmov 0   ;;  %s1462_s0 = inlined_call_operand.vmem [shape: f32[16,8,4], index: 0, kind: input, shape index: {}]   ;;  %s1463_s1 = inlined_call_operand.vmem [shape: f32[4,16], index: 1, kind: input, shape index: {}]   ;;  %s1464_s2 = inlined_call_operand.vmem [shape: f32[1,16], index: 2, kind: input, shape index: {}]   ;;  %s1465_s3 = inlined_call_operand.vmem [shape: f32[16,8], index: 3, kind: input, shape index: {}]   ;;  %s1466_s4 = inlined_call_operand.hbm [shape: f32[16,8,32], index: 4, kind: output, shape index: {}]  }
   0x1   :  { %v921_v0 = vld [vmem:[%s1462_s0 + $0x10] sm:$0xff]  ;;  %v926_v1 = vld [vmem:[%s1462_s0] sm:$0xff]  ;;  %856 = vset.pattern.permute.xlu1 %v885_v2  ;;  %855 = vset.pattern.permute.xlu0 %v885_v2  ;;  %v933_v3 = vld [vmem:[%s1462_s0 + $0x18] sm:$0xff] }
   0x2   :  { %54 = vperm.xlu1 %856, %v921_v0   ;;  %44 = vperm.xlu0 %855, %v926_v1   ;;  %v938_v4 = vld [vmem:[%s1462_s0 + $0x8] sm:$0xff] }
   0x6   :  { %59 = vperm.xlu1 %856, %v933_v3   ;;  %49 = vperm.xlu0 %855, %v938_v4  }
   0x7   :  { %9 = vsyncpa [#allocation3], 0  ;;  %v945_v5 = vld [vmem:[%s1462_s0 + $0x28] sm:$0xff]  ;;  %v950_v6 = vld [vmem:[%s1462_s0 + $0x20] sm:$0xff]  ;;  %v886_v17 = vmov 1   ;;  %v887_v18 = vmov 2   ;;  %v122_v20 = vlaneseq }
   0x8   :  { %v957_v7 = vld [vmem:[%s1462_s0 + $0x38] sm:$0xff]  ;;  %v962_v8 = vld [vmem:[%s1462_s0 + $0x30] sm:$0xff]  ;;  %v969_v9 = vld [vmem:[%s1462_s0 + $0x48] sm:$0xff]  ;;  %v888_v19 = vmov 3   ;;  %vm474_vm0 = vcmask 130048   ;;  %vm813_vm1 = vcmask 261248  }
   0x9   :  { %v974_v10 = vld [vmem:[%s1462_s0 + $0x40] sm:$0xff]  ;;  %v981_v11 = vld [vmem:[%s1462_s0 + $0x58] sm:$0xff]  ;;  %v986_v12 = vld [vmem:[%s1462_s0 + $0x50] sm:$0xff]  ;;  %v1054_v21 = vshrl.u32 %v122_v20, 7  ;;  %s890_s26 = smov [#allocation2]  }
   0xa   :  { %69 = vperm.xlu1 %856, %v945_v5   ;;  %64 = vperm.xlu0 %855, %v950_v6   ;;  %v993_v13 = vld [vmem:[%s1462_s0 + $0x68] sm:$0xff]  ;;  %v998_v14 = vld [vmem:[%s1462_s0 + $0x60] sm:$0xff]  ;;  %v1005_v15 = vld [vmem:[%s1462_s0 + $0x78] sm:$0xff]  ;;  %s835_s27 = sshll.u32 %s890_s26, 4  ;;  %s836_s27 = int_to_ptr.vmem [resolvable:$true] %s835_s27 }
   0xb   :  { %v1010_v16 = vld [vmem:[%s1462_s0 + $0x70] sm:$0xff]  ;;  %v1059_v22 = vsub.s32 0, %v1054_v21  ;;  %v1064_v23 = vld [vmem:[%s1463_s1] sm:$0xf]  ;;  %v1069_v24 = vsub.s32 1, %v1054_v21  ;;  %v1082_v30 = vsub.s32 3, %v1054_v21  ;;  %p868_p1 = scmp.lt.s32.totalorder %s836_s27, %s836_s27 }
   0xc   :  { %v587_v26 = vld [vmem:[%s1465_s3] sm:$0xff]  ;;  %v626_v36 = vsub.s32 5, %v1054_v21  ;;  %v1100_v43 = vsub.s32 2, %v1054_v21  ;;  %v640_v44 = vsub.s32 7, %v1054_v21  ;;  %v619_v51 = vsub.s32 4, %v1054_v21  ;;  %v588_v54 = vld [vmem:[%s1465_s3 + $0x8] sm:$0xff] }
   0xd   :  { %v1073_v25 = vrot.slane %v1064_v23, %v1059_v22  ;;  %v599_v29 = vrot.slane %v587_v26, %v1069_v24  ;;  %v613_v35 = vrot.slane %v587_v26, %v1082_v30  ;;  %v592_v41 = vrot.slane %v587_v26, %v1059_v22  ;;  %s863_s28 = scalar_lea.vmem %s836_s27, 2048 }
   0xe   :  { %79 = vperm.xlu1 %856, %v957_v7   ;;  %74 = vperm.xlu0 %855, %v962_v8   ;;  %v627_v42 = vrot.slane %v587_v26, %v626_v36  ;;  %v606_v49 = vrot.slane %v587_v26, %v1100_v43  ;;  %v641_v50 = vrot.slane %v587_v26, %v640_v44  ;;  %v633_v59 = vsub.s32 6, %v1054_v21  ;;  %p864_p0 = scmp.ne.s32.totalorder %s836_s27, %s863_s28  ;;  %p869_p2 = scmp.lt.s32.totalorder %s863_s28, %s863_s28 }
   0xf   :  { %v620_v57 = vrot.slane %v587_v26, %v619_v51  ;;  %v655_v58 = vrot.slane %v588_v54, %v1069_v24 }
  0x10   :  { %p870_p3 = por %p869_p2, %p868_p1 }
  0x12   :  { %89 = vperm.xlu1 %856, %v969_v9   ;;  %84 = vperm.xlu0 %855, %v974_v10   ;;  %p871_p4 = pnand %p870_p3, %p864_p0 }
  0x16   :  { %99 = vperm.xlu1 %856, %v981_v11   ;;  %94 = vperm.xlu0 %855, %v986_v12  }
  0x1a   :  { %109 = vperm.xlu1 %856, %v993_v13   ;;  %104 = vperm.xlu0 %855, %v998_v14  }
  0x1e   :  { %119 = vperm.xlu1 %856, %v1005_v15   ;;  %114 = vperm.xlu0 %855, %v1010_v16  }
  0x22   :  { %858 = vset.pattern.permute.xlu1 %v886_v17  ;;  %857 = vset.pattern.permute.xlu0 %v886_v17  ;;  %v676_v17 = vrot.slane %v588_v54, %v619_v51 }
  0x23   :  { %163 = vperm.xlu1 %858, %v938_v4   ;;  %159 = vperm.xlu0 %857, %v926_v1  }
  0x27   :  { %167 = vperm.xlu1 %858, %v921_v0   ;;  %171 = vperm.xlu0 %857, %v933_v3  }
  0x2b   :  { %175 = vperm.xlu1 %858, %v950_v6   ;;  %179 = vperm.xlu0 %857, %v945_v5  }
  0x2f   :  { %183 = vperm.xlu1 %858, %v962_v8   ;;  %187 = vperm.xlu0 %857, %v957_v7  }
  0x33   :  { %191 = vperm.xlu1 %858, %v974_v10   ;;  %195 = vperm.xlu0 %857, %v969_v9  }
  0x37   :  { %199 = vperm.xlu1 %858, %v986_v12   ;;  %203 = vperm.xlu0 %857, %v981_v11  }
  0x3b   :  { %207 = vperm.xlu1 %858, %v998_v14   ;;  %211 = vperm.xlu0 %857, %v993_v13  }
  0x3f   :  { %215 = vperm.xlu1 %858, %v1010_v16   ;;  %219 = vperm.xlu0 %857, %v1005_v15  }
  0x43   :  { %859 = vset.pattern.permute.xlu1 %v887_v18  ;;  %860 = vset.pattern.permute.xlu0 %v887_v18  ;;  %v1156_v18 = vld [vmem:[%s1464_s2] ss:$0 sm:$0xff]  ;;  %s889_s2 = smov 16  }
  0x44   :  { %259 = vperm.xlu1 %859, %v926_v1   ;;  %263 = vperm.xlu0 %860, %v938_v4  }
  0x48   :  { %267 = vperm.xlu1 %859, %v921_v0   ;;  %275 = vperm.xlu0 %860, %v950_v6  }
  0x4c   :  { %271 = vperm.xlu1 %859, %v933_v3   ;;  %283 = vperm.xlu0 %860, %v962_v8  }
  0x50   :  { %279 = vperm.xlu1 %859, %v945_v5   ;;  %291 = vperm.xlu0 %860, %v974_v10  }
  0x54   :  { %287 = vperm.xlu1 %859, %v957_v7   ;;  %299 = vperm.xlu0 %860, %v986_v12  }
  0x58   :  { %295 = vperm.xlu1 %859, %v969_v9   ;;  %307 = vperm.xlu0 %860, %v998_v14  }
  0x5c   :  { %303 = vperm.xlu1 %859, %v981_v11   ;;  %315 = vperm.xlu0 %860, %v1010_v16  }
  0x60   :  { %311 = vperm.xlu1 %859, %v993_v13   ;;  %861 = vset.pattern.permute.xlu0 %v888_v19 }
  0x61   :  { %359 = vperm.xlu0 %861, %v926_v1   ;;  %v669_v1 = vrot.slane %v588_v54, %v1082_v30 }
  0x64   :  { %319 = vperm.xlu1 %859, %v1005_v15  }
  0x65   :  { %371 = vperm.xlu0 %861, %v933_v3  }
  0x68   :  { %862 = vset.pattern.permute.xlu1 %v888_v19 }
  0x69   :  { %363 = vperm.xlu1 %862, %v938_v4   ;;  %379 = vperm.xlu0 %861, %v945_v5  }
  0x6d   :  { %367 = vperm.xlu1 %862, %v921_v0   ;;  %387 = vperm.xlu0 %861, %v957_v7   ;;  %v634_v0 = vrot.slane %v587_v26, %v633_v59  ;;  %v683_v7 = vrot.slane %v588_v54, %v626_v36 }
  0x71   :  { %375 = vperm.xlu1 %862, %v950_v6   ;;  %395 = vperm.xlu0 %861, %v969_v9   ;;  %v648_v6 = vrot.slane %v588_v54, %v1059_v22 }
  0x75   :  { %383 = vperm.xlu1 %862, %v962_v8   ;;  %403 = vperm.xlu0 %861, %v981_v11  }
  0x79   :  { %391 = vperm.xlu1 %862, %v974_v10   ;;  %411 = vperm.xlu0 %861, %v993_v13   ;;  %v697_v13 = vrot.slane %v588_v54, %v640_v44 }
  0x7d   :  { %v55_v27 = vpop.permute.xlu1 %54  ;;  %399 = vperm.xlu1 %862, %v986_v12   ;;  %419 = vperm.xlu0 %861, %v1005_v15   ;;  %v45_v28 = vpop.permute.xlu0 %44  ;;  %v662_v12 = vrot.slane %v588_v54, %v1100_v43 }
  0x7e   :  { %v1085_v31 = vmul.f32 %v1073_v25, %v55_v27  ;;  %v1088_v32 = vmul.f32 %v1073_v25, %v45_v28  ;;  %v690_v28 = vrot.slane %v588_v54, %v633_v59 }
  0x80   :  { %v142_v21 = vadd.f32 %v1156_v18, %v1088_v32 }
  0x81   :  { %v60_v33 = vpop.permute.xlu1 %59  ;;  %407 = vperm.xlu1 %862, %v998_v14   ;;  %v50_v34 = vpop.permute.xlu0 %49  ;;  %601 = vbcast.lane.b32.xlu0 %v599_v29, 256 }
  0x82   :  { %v1094_v37 = vmul.f32 %v1073_v25, %v60_v33  ;;  %v127_v38 = vmul.f32 %v1073_v25, %v50_v34  ;;  %v144_v34 = vadd.f32 %v1156_v18, %v1085_v31 }
  0x84   :  { %v143_v22 = vadd.f32 %v1156_v18, %v127_v38  ;;  %v145_v32 = vadd.f32 %v1156_v18, %v1094_v37 }
  0x85   :  { %v70_v39 = vpop.permute.xlu1 %69  ;;  %415 = vperm.xlu1 %862, %v1010_v16   ;;  %v65_v40 = vpop.permute.xlu0 %64  ;;  %615 = vbcast.lane.b32.xlu0 %v613_v35, 256  ;;  %v1151_v16 = vrot.slane %v1064_v23, %v1069_v24 }
  0x86   :  { %v1104_v45 = vmul.f32 %v1073_v25, %v70_v39  ;;  %v1107_v46 = vmul.f32 %v1073_v25, %v65_v40 }
  0x88   :  { %v146_v44 = vadd.f32 %v1156_v18, %v1107_v46 }
  0x89   :  { %v80_v47 = vpop.permute.xlu1 %79  ;;  %v75_v48 = vpop.permute.xlu0 %74  ;;  %594 = vbcast.lane.b32.xlu1 %v592_v41, 256  ;;  %629 = vbcast.lane.b32.xlu0 %v627_v42, 256  ;;  %v147_v42 = vadd.f32 %v1156_v18, %v1104_v45 }
  0x8a   :  { %v1112_v52 = vmul.f32 %v1073_v25, %v80_v47  ;;  %v1115_v53 = vmul.f32 %v1073_v25, %v75_v48 }
  0x8c   :  { %v149_v51 = vadd.f32 %v1156_v18, %v1112_v52  ;;  %v148_v54 = vadd.f32 %v1156_v18, %v1115_v53 }
  0x8d   :  { %v90_v55 = vpop.permute.xlu1 %89  ;;  %v85_v56 = vpop.permute.xlu0 %84  ;;  %608 = vbcast.lane.b32.xlu1 %v606_v49, 256  ;;  %643 = vbcast.lane.b32.xlu0 %v641_v50, 256 }
  0x8e   :  { %v1123_v60 = vmul.f32 %v1073_v25, %v90_v55  ;;  %v1126_v61 = vmul.f32 %v1073_v25, %v85_v56 }
  0x90   :  { %v151_v59 = vadd.f32 %v1156_v18, %v1123_v60 }
  0x91   :  { %v100_v62 = vpop.permute.xlu1 %99  ;;  %v95_v63 = vpop.permute.xlu0 %94  ;;  %622 = vbcast.lane.b32.xlu1 %v620_v57, 256  ;;  %657 = vbcast.lane.b32.xlu0 %v655_v58, 256 }
  0x92   :  { %v1130_v2 = vmul.f32 %v1073_v25, %v100_v62  ;;  %v1133_v3 = vmul.f32 %v1073_v25, %v95_v63  ;;  %v150_v62 = vadd.f32 %v1156_v18, %v1126_v61 }
  0x95   :  { %v110_v4 = vpop.permute.xlu1 %109  ;;  %v105_v5 = vpop.permute.xlu0 %104  ;;  %636 = vbcast.lane.b32.xlu1 %v634_v0, 256  ;;  %671 = vbcast.lane.b32.xlu0 %v669_v1, 256 }
  0x96   :  { %v1137_v8 = vmul.f32 %v1073_v25, %v110_v4  ;;  %v1140_v9 = vmul.f32 %v1073_v25, %v105_v5  ;;  %v153_v5 = vadd.f32 %v1156_v18, %v1130_v2 }
  0x99   :  { %v120_v10 = vpop.permute.xlu1 %119  ;;  %v115_v11 = vpop.permute.xlu0 %114  ;;  %650 = vbcast.lane.b32.xlu1 %v648_v6, 256  ;;  %685 = vbcast.lane.b32.xlu0 %v683_v7, 256  ;;  %v152_v6 = vadd.f32 %v1156_v18, %v1133_v3 }
  0x9a   :  { %v1144_v14 = vmul.f32 %v1073_v25, %v120_v10  ;;  %v1147_v15 = vmul.f32 %v1073_v25, %v115_v11 }
  0x9d   :  { %664 = vbcast.lane.b32.xlu1 %v662_v12, 256  ;;  %699 = vbcast.lane.b32.xlu0 %v697_v13, 256  ;;  %v155_v13 = vadd.f32 %v1156_v18, %v1137_v8 }
  0x9e   :  { %v164_v19 = vpop.permute.xlu1 %163  ;;  %v160_v20 = vpop.permute.xlu0 %159 }
  0x9f   :  { %v227_v25 = vmul.f32 %v1151_v16, %v164_v19  ;;  %v226_v24 = vmul.f32 %v1151_v16, %v160_v20 }
  0xa1   :  { %v1163_v26 = vadd.f32 %v227_v25, %v143_v22  ;;  %v1165_v27 = vadd.f32 %v226_v24, %v142_v21  ;;  %678 = vbcast.lane.b32.xlu1 %v676_v17, 256  ;;  %v154_v17 = vadd.f32 %v1156_v18, %v1140_v9  ;;  %v157_v25 = vadd.f32 %v1156_v18, %v1144_v14 }
  0xa2   :  { %v168_v29 = vpop.permute.xlu1 %167  ;;  %v172_v33 = vpop.permute.xlu0 %171  ;;  %v156_v24 = vadd.f32 %v1156_v18, %v1147_v15  ;;  %v325_v9 = vrot.slane %v1064_v23, %v1100_v43 }
  0xa3   :  { %v228_v35 = vmul.f32 %v1151_v16, %v168_v29  ;;  %v229_v36 = vmul.f32 %v1151_v16, %v172_v33 }
  0xa5   :  { %v244_v38 = vadd.f32 %v228_v35, %v144_v34  ;;  %v1173_v39 = vadd.f32 %v229_v36, %v145_v32  ;;  %692 = vbcast.lane.b32.xlu1 %v690_v28, 256 }
  0xa6   :  { %v176_v40 = vpop.permute.xlu1 %175  ;;  %v180_v41 = vpop.permute.xlu0 %179 }
  0xa7   :  { %v230_v31 = vmul.f32 %v1151_v16, %v176_v40  ;;  %v231_v37 = vmul.f32 %v1151_v16, %v180_v41 }
  0xa9   :  { %v246_v47 = vadd.f32 %v230_v31, %v146_v44  ;;  %v1181_v48 = vadd.f32 %v231_v37, %v147_v42 }
  0xaa   :  { %v184_v49 = vpop.permute.xlu1 %183  ;;  %v188_v50 = vpop.permute.xlu0 %187 }
  0xab   :  { %v232_v45 = vmul.f32 %v1151_v16, %v184_v49  ;;  %v233_v55 = vmul.f32 %v1151_v16, %v188_v50 }
  0xad   :  { %v248_v46 = vadd.f32 %v232_v45, %v148_v54  ;;  %v249_v56 = vadd.f32 %v233_v55, %v149_v51 }
  0xae   :  { %v192_v57 = vpop.permute.xlu1 %191  ;;  %v196_v58 = vpop.permute.xlu0 %195 }
  0xaf   :  { %v234_v63 = vmul.f32 %v1151_v16, %v192_v57  ;;  %v235_v52 = vmul.f32 %v1151_v16, %v196_v58 }
  0xb1   :  { %v250_v0 = vadd.f32 %v234_v63, %v150_v62  ;;  %v251_v53 = vadd.f32 %v235_v52, %v151_v59 }
  0xb2   :  { %v200_v1 = vpop.permute.xlu1 %199  ;;  %v204_v4 = vpop.permute.xlu0 %203 }
  0xb3   :  { %v236_v7 = vmul.f32 %v1151_v16, %v200_v1  ;;  %v237_v60 = vmul.f32 %v1151_v16, %v204_v4 }
  0xb5   :  { %v252_v10 = vadd.f32 %v236_v7, %v152_v6  ;;  %v253_v61 = vadd.f32 %v237_v60, %v153_v5  ;;  %v1235_v60 = vrot.slane %v1064_v23, %v1082_v30 }
  0xb6   :  { %v208_v11 = vpop.permute.xlu1 %207  ;;  %v212_v12 = vpop.permute.xlu0 %211 }
  0xb7   :  { %v238_v19 = vmul.f32 %v1151_v16, %v208_v11  ;;  %v239_v2 = vmul.f32 %v1151_v16, %v212_v12 }
  0xb9   :  { %v254_v20 = vadd.f32 %v238_v19, %v154_v17  ;;  %v255_v3 = vadd.f32 %v239_v2, %v155_v13 }
  0xba   :  { %v216_v21 = vpop.permute.xlu1 %215  ;;  %v220_v22 = vpop.permute.xlu0 %219 }
  0xbb   :  { %v240_v28 = vmul.f32 %v1151_v16, %v216_v21  ;;  %v241_v8 = vmul.f32 %v1151_v16, %v220_v22 }
  0xbd   :  { %v256_v29 = vadd.f32 %v240_v28, %v156_v24  ;;  %v257_v33 = vadd.f32 %v241_v8, %v157_v25 }
  0xbf   :  { %v260_v34 = vpop.permute.xlu1 %259  ;;  %v264_v32 = vpop.permute.xlu0 %263 }
  0xc0   :  { %v326_v35 = vmul.f32 %v325_v9, %v260_v34  ;;  %v327_v36 = vmul.f32 %v325_v9, %v264_v32 }
  0xc2   :  { %v342_v40 = vadd.f32 %v326_v35, %v1165_v27  ;;  %v343_v14 = vadd.f32 %v327_v36, %v1163_v26 }
  0xc3   :  { %v268_v41 = vpop.permute.xlu1 %267  ;;  %v276_v42 = vpop.permute.xlu0 %275 }
  0xc4   :  { %v328_v15 = vmul.f32 %v325_v9, %v268_v41  ;;  %v330_v18 = vmul.f32 %v325_v9, %v276_v42 }
  0xc6   :  { %v1217_v44 = vadd.f32 %v328_v15, %v244_v38  ;;  %v1219_v16 = vadd.f32 %v330_v18, %v246_v47 }
  0xc7   :  { %v272_v31 = vpop.permute.xlu1 %271  ;;  %v284_v43 = vpop.permute.xlu0 %283 }
  0xc8   :  { %v329_v37 = vmul.f32 %v325_v9, %v272_v31  ;;  %v332_v49 = vmul.f32 %v325_v9, %v284_v43 }
  0xca   :  { %v345_v50 = vadd.f32 %v329_v37, %v1173_v39  ;;  %v1222_v51 = vadd.f32 %v332_v49, %v248_v46 }
  0xcb   :  { %v280_v54 = vpop.permute.xlu1 %279  ;;  %v292_v27 = vpop.permute.xlu0 %291 }
  0xcc   :  { %v331_v45 = vmul.f32 %v325_v9, %v280_v54  ;;  %v334_v26 = vmul.f32 %v325_v9, %v292_v27 }
  0xce   :  { %v347_v55 = vadd.f32 %v331_v45, %v1181_v48  ;;  %v1225_v57 = vadd.f32 %v334_v26, %v250_v0 }
  0xcf   :  { %v288_v38 = vpop.permute.xlu1 %287  ;;  %v300_v58 = vpop.permute.xlu0 %299 }
  0xd0   :  { %v333_v47 = vmul.f32 %v325_v9, %v288_v38  ;;  %v336_v59 = vmul.f32 %v325_v9, %v300_v58 }
  0xd2   :  { %v349_v62 = vadd.f32 %v333_v47, %v249_v56  ;;  %v1227_v63 = vadd.f32 %v336_v59, %v252_v10 }
  0xd3   :  { %v296_v52 = vpop.permute.xlu1 %295  ;;  %v308_v1 = vpop.permute.xlu0 %307 }
  0xd4   :  { %v335_v39 = vmul.f32 %v325_v9, %v296_v52  ;;  %v338_v46 = vmul.f32 %v325_v9, %v308_v1 }
  0xd6   :  { %v1229_v4 = vadd.f32 %v335_v39, %v251_v53  ;;  %v1231_v5 = vadd.f32 %v338_v46, %v254_v20 }
  0xd7   :  { %v304_v6 = vpop.permute.xlu1 %303  ;;  %v316_v7 = vpop.permute.xlu0 %315 }
  0xd8   :  { %v337_v48 = vmul.f32 %v325_v9, %v304_v6  ;;  %v340_v0 = vmul.f32 %v325_v9, %v316_v7 }
  0xda   :  { %v1237_v11 = vadd.f32 %v337_v48, %v253_v61  ;;  %v1239_v56 = vadd.f32 %v340_v0, %v256_v29 }
  0xdb   :  { %v312_v10 = vpop.permute.xlu1 %311 }
  0xdc   :  { %v339_v12 = vmul.f32 %v325_v9, %v312_v10  ;;  %v360_v13 = vpop.permute.xlu0 %359 }
  0xdd   :  { %v426_v53 = vmul.f32 %v1235_v60, %v360_v13 }
  0xde   :  { %v1242_v17 = vadd.f32 %v339_v12, %v255_v3 }
  0xdf   :  { %v1244_v19 = vadd.f32 %v426_v53, %v342_v40  ;;  %v320_v2 = vpop.permute.xlu1 %319 }
  0xe0   :  { %v341_v20 = vmul.f32 %v325_v9, %v320_v2  ;;  %v372_v21 = vpop.permute.xlu0 %371 }
  0xe1   :  { %v458_v23 = vmax.f32 %v1244_v19, 0.0  ;;  %v429_v30 = vmul.f32 %v1235_v60, %v372_v21 }
  0xe2   :  { %v1248_v61 = vadd.f32 %v341_v20, %v257_v33 }
  0xe3   :  { %v475_v22 = vsel %vm474_vm0, %v458_v23, -inf  ;;  %v1253_v25 = vadd.f32 %v429_v30, %v345_v50 }
  0xe4   :  { %v476_v3 = vrot.slane %v475_v22, 4  ;;  %v364_v24 = vpop.permute.xlu1 %363  ;;  %v380_v28 = vpop.permute.xlu0 %379 }
  0xe5   :  { %v461_v8 = vmax.f32 %v1253_v25, 0.0  ;;  %v427_v9 = vmul.f32 %v1235_v60, %v364_v24  ;;  %v431_v29 = vmul.f32 %v1235_v60, %v380_v28 }
  0xe6   :  { %v477_v34 = vmax.f32 %v475_v22, %v476_v3 }
  0xe7   :  { %v496_v33 = vsel %vm474_vm0, %v461_v8, -inf  ;;  %v1261_v32 = vadd.f32 %v427_v9, %v343_v14  ;;  %v1263_v35 = vadd.f32 %v431_v29, %v347_v55 }
  0xe8   :  { %v497_v36 = vrot.slane %v496_v33, 4  ;;  %v368_v40 = vpop.permute.xlu1 %367  ;;  %v388_v41 = vpop.permute.xlu0 %387  ;;  %v478_v42 = vrot.slane %v477_v34, 2 }
  0xe9   :  { %v459_v15 = vmax.f32 %v1261_v32, 0.0  ;;  %v463_v18 = vmax.f32 %v1263_v35, 0.0  ;;  %v428_v31 = vmul.f32 %v1235_v60, %v368_v40  ;;  %v433_v43 = vmul.f32 %v1235_v60, %v388_v41 }
  0xea   :  { %v498_v37 = vmax.f32 %v496_v33, %v497_v36  ;;  %v479_v49 = vmax.f32 %v477_v34, %v478_v42 }
  0xeb   :  { %v482_v14 = vsel %vm474_vm0, %v459_v15, -inf  ;;  %v510_v50 = vsel %vm474_vm0, %v463_v18, -inf  ;;  %v1276_v54 = vadd.f32 %v428_v31, %v1217_v44  ;;  %v1278_v27 = vadd.f32 %v433_v43, %v349_v62 }
  0xec   :  { %v483_v45 = vrot.slane %v482_v14, 4  ;;  %v511_v26 = vrot.slane %v510_v50, 4  ;;  %v376_v55 = vpop.permute.xlu1 %375  ;;  %v396_v38 = vpop.permute.xlu0 %395  ;;  %v499_v58 = vrot.slane %v498_v37, 2  ;;  %v480_v6 = vrot.slane %v479_v49, 1 }
  0xed   :  { %v460_v47 = vmax.f32 %v1276_v54, 0.0  ;;  %v465_v59 = vmax.f32 %v1278_v27, 0.0  ;;  %v430_v52 = vmul.f32 %v1235_v60, %v376_v55  ;;  %v435_v1 = vmul.f32 %v1235_v60, %v396_v38 }
  0xee   :  { %v484_v39 = vmax.f32 %v482_v14, %v483_v45  ;;  %v500_v46 = vmax.f32 %v498_v37, %v499_v58  ;;  %v512_v0 = vmax.f32 %v510_v50, %v511_v26  ;;  %v1300_v28 = vmax.f32 %v479_v49, %v480_v6 }
  0xef   :  { %v489_v44 = vsel %vm474_vm0, %v460_v47, -inf  ;;  %v524_v62 = vsel %vm474_vm0, %v465_v59, -inf  ;;  %v1291_v7 = vadd.f32 %v430_v52, %v1219_v16  ;;  %v1294_v48 = vadd.f32 %v435_v1, %v1229_v4 }
  0xf0   :  { %v490_v10 = vrot.slane %v489_v44, 4  ;;  %v525_v12 = vrot.slane %v524_v62, 4  ;;  %v384_v13 = vpop.permute.xlu1 %383  ;;  %v404_v53 = vpop.permute.xlu0 %403  ;;  %v485_v2 = vrot.slane %v484_v39, 2  ;;  %v501_v24 = vrot.slane %v500_v46, 1 }
  0xf1   :  { %v462_v20 = vmax.f32 %v1291_v7, 0.0  ;;  %v467_v21 = vmax.f32 %v1294_v48, 0.0  ;;  %v432_v30 = vmul.f32 %v1235_v60, %v384_v13  ;;  %v437_v22 = vmul.f32 %v1235_v60, %v404_v53 }
  0xf2   :  { %v491_v3 = vmax.f32 %v489_v44, %v490_v10  ;;  %v486_v16 = vmax.f32 %v484_v39, %v485_v2  ;;  %v526_v33 = vmax.f32 %v524_v62, %v525_v12  ;;  %v513_v31 = vrot.slane %v512_v0, 2 }
  0xf3   :  { %v503_v4 = vsel %vm474_vm0, %v462_v20, -inf  ;;  %v538_v9 = vsel %vm474_vm0, %v467_v21, -inf  ;;  %v1309_v29 = vadd.f32 %v432_v30, %v1222_v51  ;;  %v1312_v34 = vadd.f32 %v437_v22, %v1237_v11 }
  0xf4   :  { %v504_v36 = vrot.slane %v503_v4, 4  ;;  %v539_v40 = vrot.slane %v538_v9, 4  ;;  %v392_v41 = vpop.permute.xlu1 %391  ;;  %v412_v42 = vpop.permute.xlu0 %411  ;;  %v487_v51 = vrot.slane %v486_v16, 1  ;;  %v502_v45 = vmax.f32 %v500_v46, %v501_v24 }
  0xf5   :  { %v464_v43 = vmax.f32 %v1309_v29, 0.0  ;;  %v469_v37 = vmax.f32 %v1312_v34, 0.0  ;;  %v434_v49 = vmul.f32 %v1235_v60, %v392_v41  ;;  %v439_v14 = vmul.f32 %v1235_v60, %v412_v42 }
  0xf6   :  { %v505_v50 = vmax.f32 %v503_v4, %v504_v36  ;;  %v514_v26 = vmax.f32 %v512_v0, %v513_v31  ;;  %v540_v52 = vmax.f32 %v538_v9, %v539_v40  ;;  %v492_v44 = vrot.slane %v491_v3, 2 }
  0xf7   :  { %v517_v11 = vsel %vm474_vm0, %v464_v43, -inf  ;;  %v552_v55 = vsel %vm474_vm0, %v469_v37, -inf  ;;  %v1325_v38 = vadd.f32 %v434_v49, %v1225_v57  ;;  %v1328_v58 = vadd.f32 %v439_v14, %v1242_v17 }
  0xf8   :  { %v518_v1 = vrot.slane %v517_v11, 4  ;;  %v553_v39 = vrot.slane %v552_v55, 4  ;;  %v400_v6 = vpop.permute.xlu1 %399  ;;  %v420_v46 = vpop.permute.xlu0 %419  ;;  %v488_v57 = vmax.f32 %v486_v16, %v487_v51  ;;  %v515_v53 = vrot.slane %v514_v26, 1 }
  0xf9   :  { %v466_v62 = vmax.f32 %v1325_v38, 0.0  ;;  %v471_v0 = vmax.f32 %v1328_v58, 0.0  ;;  %v436_v10 = vmul.f32 %v1235_v60, %v400_v6  ;;  %v441_v12 = vmul.f32 %v1235_v60, %v420_v46 }
  0xfa   :  { %v1334_v13 = vmax.f32 %v517_v11, %v518_v1  ;;  %v493_v17 = vmax.f32 %v491_v3, %v492_v44  ;;  %v554_v4 = vmax.f32 %v552_v55, %v553_v39  ;;  %v527_v3 = vrot.slane %v526_v33, 2 }
  0xfb   :  { %v531_v2 = vsel %vm474_vm0, %v466_v62, -inf  ;;  %v566_v30 = vsel %vm474_vm0, %v471_v0, -inf  ;;  %v1343_v22 = vadd.f32 %v436_v10, %v1227_v63  ;;  %v1346_v24 = vadd.f32 %v441_v12, %v1248_v61 }
  0xfc   :  { %v532_v9 = vrot.slane %v531_v2, 4  ;;  %v567_v36 = vrot.slane %v566_v30, 4  ;;  %v408_v16 = vpop.permute.xlu1 %407  ;;  %v602_v40 = vpop.permute.xlu0 %601  ;;  %v516_v61 = vmax.f32 %v514_v26, %v515_v53  ;;  %v494_v51 = vrot.slane %v493_v17, 1 }
  0xfd   :  { %v468_v41 = vmax.f32 %v1343_v22, 0.0  ;;  %v473_v42 = vmax.f32 %v1346_v24, 0.0  ;;  %v438_v31 = vmul.f32 %v1235_v60, %v408_v16  ;;  %v702_v49 = vmul.f32 %v602_v40, %v459_v15 }
  0xfe   :  { %v1353_v63 = vmax.f32 %v531_v2, %v532_v9  ;;  %v734_v14 = vmul.f32 %v602_v40, %v488_v57  ;;  %v528_v32 = vmax.f32 %v526_v33, %v527_v3  ;;  %v568_v15 = vmax.f32 %v566_v30, %v567_v36 }
  0xff   :  { %v545_v11 = vsel %vm474_vm0, %v468_v41, -inf  ;;  %v580_v55 = vsel %vm474_vm0, %v473_v42, -inf  ;;  %v1362_v1 = vadd.f32 %v438_v31, %v1231_v5  ;;  %718 = vst.msk [vmem:[#allocation2 + $0x8] sm:$0xff] %vm474_vm0, %v702_v49  ;;  %v506_v46 = vrot.slane %v505_v50, 2 }
 0x100   :  { %v546_v39 = vrot.slane %v545_v11, 4  ;;  %767 = vrot.lane.b32.xlu0 %v734_v14, %s889_s2  ;;  %v416_v26 = vpop.permute.xlu1 %415  ;;  %v616_v6 = vpop.permute.xlu0 %615  ;;  %v541_v44 = vrot.slane %v540_v52, 2  ;;  %v581_v53 = vrot.slane %v580_v55, 4  ;;  %v495_v2 = vmax.f32 %v493_v17, %v494_v51 }
 0x101   :  { %v470_v10 = vmax.f32 %v1362_v1, 0.0  ;;  %v440_v12 = vmul.f32 %v1235_v60, %v416_v26  ;;  %v704_v5 = vmul.f32 %v616_v6, %v461_v8  ;;  %v736_v57 = vmul.f32 %v616_v6, %v502_v45 }
 0x102   :  { %v529_v33 = vrot.slane %v528_v32, 1  ;;  %v507_v30 = vmax.f32 %v505_v50, %v506_v46  ;;  %v542_v16 = vmax.f32 %v540_v52, %v541_v44  ;;  %v520_v60 = vrot.slane %v1334_v13, 2 }
 0x103   :  { %v559_v9 = vsel %vm474_vm0, %v470_v10, -inf  ;;  %v1374_v36 = vadd.f32 %v440_v12, %v1239_v56  ;;  %720 = vst.msk [vmem:[#allocation2 + $0x18] sm:$0xff] %vm474_vm0, %v704_v5  ;;  %v547_v40 = vmax.f32 %v545_v11, %v546_v39  ;;  %v555_v50 = vrot.slane %v554_v4, 2 }
 0x104   :  { %v560_v25 = vrot.slane %v559_v9, 4  ;;  %771 = vrot.lane.b32.xlu0 %v736_v57, %s889_s2  ;;  %v595_v8 = vpop.permute.xlu1 %594  ;;  %v630_v45 = vpop.permute.xlu0 %629  ;;  %v508_v17 = vrot.slane %v507_v30, 1  ;;  %v582_v49 = vmax.f32 %v580_v55, %v581_v53  ;;  %v530_v51 = vmax.f32 %v528_v32, %v529_v33 }
 0x105   :  { %v472_v3 = vmax.f32 %v1374_v36, 0.0  ;;  %v701_v31 = vmul.f32 %v595_v8, %v458_v23  ;;  %v733_v56 = vmul.f32 %v595_v8, %v1300_v28  ;;  %v706_v52 = vmul.f32 %v630_v45, %v463_v18 }
 0x106   :  { %v738_v14 = vmul.f32 %v630_v45, %v516_v61  ;;  %v543_v11 = vrot.slane %v542_v16, 1  ;;  %v521_v19 = vmax.f32 %v1334_v13, %v520_v60  ;;  %v556_v23 = vmax.f32 %v554_v4, %v555_v50 }
 0x107   :  { %v573_v39 = vsel %vm474_vm0, %v472_v3, -inf  ;;  %717 = vst.msk [vmem:[#allocation2] sm:$0xff] %vm474_vm0, %v701_v31  ;;  %722 = vst.msk [vmem:[#allocation2 + $0x28] sm:$0xff] %vm474_vm0, %v706_v52  ;;  %765 = vrot.lane.b32.xlu1 %v733_v56, %s889_s2  ;;  %v534_v35 = vrot.slane %v1353_v63, 2  ;;  %v561_v18 = vmax.f32 %v559_v9, %v560_v25  ;;  %v509_v55 = vmax.f32 %v507_v30, %v508_v17 }
 0x108   :  { %775 = vrot.lane.b32.xlu0 %v738_v14, %s889_s2  ;;  %v609_v28 = vpop.permute.xlu1 %608  ;;  %v644_v61 = vpop.permute.xlu0 %643  ;;  %v569_v32 = vrot.slane %v568_v15, 2  ;;  %v574_v12 = vrot.slane %v573_v39, 4  ;;  %v544_v13 = vmax.f32 %v542_v16, %v543_v11  ;;  %v548_v5 = vrot.slane %v547_v40, 2 }
 0x109   :  { %v703_v26 = vmul.f32 %v609_v28, %v460_v47  ;;  %v735_v6 = vmul.f32 %v609_v28, %v495_v2  ;;  %v708_v46 = vmul.f32 %v644_v61, %v465_v59  ;;  %v740_v44 = vmul.f32 %v644_v61, %v530_v51 }
 0x10a   :  { %v535_v4 = vmax.f32 %v1353_v63, %v534_v35  ;;  %v522_v57 = vrot.slane %v521_v19, 1  ;;  %v557_v53 = vrot.slane %v556_v23, 1  ;;  %v570_v54 = vmax.f32 %v568_v15, %v569_v32 }
 0x10b   :  { %719 = vst.msk [vmem:[#allocation2 + $0x10] sm:$0xff] %vm474_vm0, %v703_v26  ;;  %724 = vst.msk [vmem:[#allocation2 + $0x38] sm:$0xff] %vm474_vm0, %v708_v46  ;;  %769 = vrot.lane.b32.xlu1 %v735_v6, %s889_s2  ;;  %v583_v47 = vrot.slane %v582_v49, 2  ;;  %v575_v9 = vmax.f32 %v573_v39, %v574_v12  ;;  %v549_v60 = vmax.f32 %v547_v40, %v548_v5  ;;  %v562_v25 = vrot.slane %v561_v18, 2 }
 0x10c   :  { %779 = vrot.lane.b32.xlu0 %v740_v44, %s889_s2  ;;  %v623_v27 = vpop.permute.xlu1 %622  ;;  %v658_v59 = vpop.permute.xlu0 %657  ;;  %v536_v16 = vrot.slane %v535_v4, 1  ;;  %v523_v15 = vmax.f32 %v521_v19, %v522_v57  ;;  %v558_v8 = vmax.f32 %v556_v23, %v557_v53  ;;  %v571_v45 = vrot.slane %v570_v54, 1 }
 0x10d   :  { %v705_v2 = vmul.f32 %v623_v27, %v462_v20  ;;  %v737_v33 = vmul.f32 %v623_v27, %v509_v55  ;;  %v710_v63 = vmul.f32 %v658_v59, %v467_v21  ;;  %v742_v30 = vmul.f32 %v658_v59, %v544_v13 }
 0x10e   :  { %v584_v7 = vmax.f32 %v582_v49, %v583_v47  ;;  %v537_v31 = vmax.f32 %v535_v4, %v536_v16  ;;  %v576_v56 = vrot.slane %v575_v9, 2  ;;  %v572_v52 = vmax.f32 %v570_v54, %v571_v45 }
 0x10f   :  { %721 = vst.msk [vmem:[#allocation2 + $0x20] sm:$0xff] %vm474_vm0, %v705_v2  ;;  %726 = vst.msk [vmem:[#allocation2 + $0x48] sm:$0xff] %vm474_vm0, %v710_v63  ;;  %773 = vrot.lane.b32.xlu1 %v737_v33, %s889_s2  ;;  %v550_v49 = vrot.slane %v549_v60, 1  ;;  %v563_v51 = vmax.f32 %v561_v18, %v562_v25 }
 0x110   :  { %783 = vrot.lane.b32.xlu0 %v742_v30, %s889_s2  ;;  %v637_v20 = vpop.permute.xlu1 %636  ;;  %v672_v48 = vpop.permute.xlu0 %671  ;;  %v585_v14 = vrot.slane %v584_v7, 1  ;;  %v577_v18 = vmax.f32 %v575_v9, %v576_v56 }
 0x111   :  { %v707_v21 = vmul.f32 %v637_v20, %v464_v43  ;;  %v739_v17 = vmul.f32 %v637_v20, %v523_v15  ;;  %v712_v40 = vmul.f32 %v672_v48, %v469_v37  ;;  %v744_v50 = vmul.f32 %v672_v48, %v558_v8 }
 0x112   :  { %v551_v19 = vmax.f32 %v549_v60, %v550_v49  ;;  %v586_v23 = vmax.f32 %v584_v7, %v585_v14  ;;  %v564_v35 = vrot.slane %v563_v51, 1  ;;  %v578_v32 = vrot.slane %v577_v18, 1 }
 0x113   :  { %723 = vst.msk [vmem:[#allocation2 + $0x30] sm:$0xff] %vm474_vm0, %v707_v21  ;;  %728 = vst.msk [vmem:[#allocation2 + $0x58] sm:$0xff] %vm474_vm0, %v712_v40  ;;  %777 = vrot.lane.b32.xlu1 %v739_v17, %s889_s2 }
 0x114   :  { %787 = vrot.lane.b32.xlu0 %v744_v50, %s889_s2  ;;  %v651_v29 = vpop.permute.xlu1 %650  ;;  %v686_v43 = vpop.permute.xlu0 %685  ;;  %v565_v55 = vmax.f32 %v563_v51, %v564_v35  ;;  %v579_v24 = vmax.f32 %v577_v18, %v578_v32 }
 0x115   :  { %v709_v34 = vmul.f32 %v651_v29, %v466_v62  ;;  %v741_v37 = vmul.f32 %v651_v29, %v537_v31  ;;  %v714_v11 = vmul.f32 %v686_v43, %v471_v0  ;;  %v746_v39 = vmul.f32 %v686_v43, %v572_v52 }
 0x117   :  { %725 = vst.msk [vmem:[#allocation2 + $0x40] sm:$0xff] %vm474_vm0, %v709_v34  ;;  %730 = vst.msk [vmem:[#allocation2 + $0x68] sm:$0xff] %vm474_vm0, %v714_v11  ;;  %781 = vrot.lane.b32.xlu1 %v741_v37, %s889_s2 }
 0x118   :  { %791 = vrot.lane.b32.xlu0 %v746_v39, %s889_s2  ;;  %v665_v28 = vpop.permute.xlu1 %664  ;;  %v700_v38 = vpop.permute.xlu0 %699 }
 0x119   :  { %v711_v62 = vmul.f32 %v665_v28, %v468_v41  ;;  %v743_v58 = vmul.f32 %v665_v28, %v551_v19  ;;  %v716_v0 = vmul.f32 %v700_v38, %v473_v42  ;;  %v748_v61 = vmul.f32 %v700_v38, %v586_v23 }
 0x11b   :  { %727 = vst.msk [vmem:[#allocation2 + $0x50] sm:$0xff] %vm474_vm0, %v711_v62  ;;  %732 = vst.msk [vmem:[#allocation2 + $0x78] sm:$0xff] %vm474_vm0, %v716_v0  ;;  %785 = vrot.lane.b32.xlu1 %v743_v58, %s889_s2 }
 0x11c   :  { %795 = vrot.lane.b32.xlu0 %v748_v61, %s889_s2  ;;  %v679_v26 = vpop.permute.xlu1 %678 }
 0x11d   :  { %v713_v22 = vmul.f32 %v679_v26, %v470_v10  ;;  %v745_v41 = vmul.f32 %v679_v26, %v565_v55 }
 0x11f   :  { %729 = vst.msk [vmem:[#allocation2 + $0x60] sm:$0xff] %vm474_vm0, %v713_v22  ;;  %789 = vrot.lane.b32.xlu1 %v745_v41, %s889_s2 }
 0x120   :  { %v693_v42 = vpop.permute.xlu1 %692 }
 0x121   :  { %v715_v6 = vmul.f32 %v693_v42, %v472_v3  ;;  %v747_v46 = vmul.f32 %v693_v42, %v579_v24 }
 0x123   :  { %731 = vst.msk [vmem:[#allocation2 + $0x70] sm:$0xff] %vm474_vm0, %v715_v6  ;;  %793 = vrot.lane.b32.xlu1 %v747_v46, %s889_s2 }
 0x172   :  { %v768_v44 = vpop.permute.xlu0 %767 }
 0x173   :  { %815 = vst.msk [vmem:[#allocation2 + $0x8] sm:$0xff] %vm813_vm1, %v768_v44 }
 0x176   :  { %v772_v1 = vpop.permute.xlu0 %771 }
 0x177   :  { %817 = vst.msk [vmem:[#allocation2 + $0x18] sm:$0xff] %vm813_vm1, %v772_v1 }
 0x179   :  { %v766_v10 = vpop.permute.xlu1 %765 }
 0x17a   :  { %814 = vst.msk [vmem:[#allocation2] sm:$0xff] %vm813_vm1, %v766_v10  ;;  %v776_v12 = vpop.permute.xlu0 %775 }
 0x17b   :  { %819 = vst.msk [vmem:[#allocation2 + $0x28] sm:$0xff] %vm813_vm1, %v776_v12 }
 0x17d   :  { %v770_v36 = vpop.permute.xlu1 %769 }
 0x17e   :  { %816 = vst.msk [vmem:[#allocation2 + $0x10] sm:$0xff] %vm813_vm1, %v770_v36  ;;  %v780_v3 = vpop.permute.xlu0 %779 }
 0x17f   :  { %821 = vst.msk [vmem:[#allocation2 + $0x38] sm:$0xff] %vm813_vm1, %v780_v3 }
 0x181   :  { %v774_v13 = vpop.permute.xlu1 %773 }
 0x182   :  { %818 = vst.msk [vmem:[#allocation2 + $0x20] sm:$0xff] %vm813_vm1, %v774_v13  ;;  %v784_v4 = vpop.permute.xlu0 %783 }
 0x183   :  { %823 = vst.msk [vmem:[#allocation2 + $0x48] sm:$0xff] %vm813_vm1, %v784_v4 }
 0x185   :  { %v778_v5 = vpop.permute.xlu1 %777 }
 0x186   :  { %820 = vst.msk [vmem:[#allocation2 + $0x30] sm:$0xff] %vm813_vm1, %v778_v5  ;;  %v788_v57 = vpop.permute.xlu0 %787 }
 0x187   :  { %825 = vst.msk [vmem:[#allocation2 + $0x58] sm:$0xff] %vm813_vm1, %v788_v57 }
 0x189   :  { %v782_v53 = vpop.permute.xlu1 %781 }
 0x18a   :  { %822 = vst.msk [vmem:[#allocation2 + $0x40] sm:$0xff] %vm813_vm1, %v782_v53  ;;  %v792_v54 = vpop.permute.xlu0 %791 }
 0x18b   :  { %827 = vst.msk [vmem:[#allocation2 + $0x68] sm:$0xff] %vm813_vm1, %v792_v54 }
 0x18d   :  { %v786_v47 = vpop.permute.xlu1 %785 }
 0x18e   :  { %824 = vst.msk [vmem:[#allocation2 + $0x50] sm:$0xff] %vm813_vm1, %v786_v47  ;;  %v796_v27 = vpop.permute.xlu0 %795 }
 0x18f   :  { %829 = vst.msk [vmem:[#allocation2 + $0x78] sm:$0xff] %vm813_vm1, %v796_v27 }
 0x191   :  { %v790_v59 = vpop.permute.xlu1 %789 }
 0x192   :  { %826 = vst.msk [vmem:[#allocation2 + $0x60] sm:$0xff] %vm813_vm1, %v790_v59 }
 0x195   :  { %v794_v2 = vpop.permute.xlu1 %793 }
 0x196   :  { %828 = vst.msk [vmem:[#allocation2 + $0x70] sm:$0xff] %vm813_vm1, %v794_v2 }
 0x197   :  { %874 = shalt.err (!%p871_p4)
}
 0x198   :  { %s891_s29 = smov 128   ;;  %s892_s30 = smov 8  }
 0x199   :  { %841 = dma.vmem_to_hbm [thread:$0]  %s836_s27, 2048, %s1466_s4, [#allocation3], %s891_s29, %s891_s29, %s892_s30  }
 0x19a   :  { %883 = dma.done.wait [#allocation3], 2048  }
 0x19b   :  { %884 = vsyncadd [#allocation3], 4294965248 }
 0x19c   :  { %845 = vsyncpa [#allocation3], 1 }

</bundles_post_ra>
